<compile_context>
chip_gen: v7x
topology: tpu7x:2x2x1
jax: 0.10.0
libtpu: 0.0.40
codegen_flags: <defaults>
</compile_context>

<pallas_src>
import functools

import jax
import jax.numpy as jnp
from jax.experimental import pallas as pl
from jax.experimental.pallas import tpu as pltpu


def fused_forward_kernel(x_ref, y_ref, w_ref, b_ref, loss_ref, act_ref, *,
                         n_layers, weights_resident):
    """One grid step = one (batch-tile, layer) pair.

    x_ref    : (TB, H)     f32   input activations for this batch tile
    y_ref    : (TB, 1)     int32 class labels for this batch tile
    w_ref    : (L|1, H, H) bf16  weights (resident stack or streamed per layer)
    b_ref    : (L|1, 1, H) f32   biases
    loss_ref : (TB, 1)     f32   per-example CE loss (written on last layer)
    act_ref  : (TB, H)     f32   VMEM scratch carrying activations across layers
    """
    l = pl.program_id(1)  # layer index ("arbitrary" axis); kept OUT of pl.when bodies

    @pl.when(l == 0)
    def _():
        act_ref[...] = x_ref[...]

    wl = w_ref[l] if weights_resident else w_ref[0]   # (H, H) bf16
    bl = b_ref[l] if weights_resident else b_ref[0]   # (1, H) f32

    # Linear layer: bf16 MXU matmul, f32 accumulation + bias add (VPU).
    h = jnp.dot(act_ref[...].astype(jnp.bfloat16), wl,
                preferred_element_type=jnp.float32) + bl
    act_ref[...] = h

    # CrossEntropy epilogue, only on the last layer of this batch tile.
    @pl.when(l == n_layers - 1)
    def _():
        logits = h                                         # (TB, H) f32
        m = jnp.max(logits, axis=-1, keepdims=True)        # lane reduce
        lse = m + jnp.log(jnp.sum(jnp.exp(logits - m), axis=-1, keepdims=True))
        y_col = y_ref[...]                                  # (TB, 1) int32
        col = jax.lax.broadcasted_iota(jnp.int32, logits.shape, 1)
        correct = jnp.sum(jnp.where(col == y_col, logits, 0.0),
                          axis=-1, keepdims=True)
        loss_ref[...] = lse - correct                       # per-example NLL


def nn_model_forward(x, y, w_stack, b_stack, *, tile_b=None):
    """Equivalent of NNModel.forward: stack of Linear layers, then mean CE loss.

    x       : (B, H)      f32
    y       : (B,)        int labels in [0, H)
    w_stack : (L, H, H)   bf16, each layer's weight pre-transposed (x @ W + b)
    b_stack : (L, 1, H)   f32
    """
    B, H = x.shape
    L = w_stack.shape[0]

    if tile_b is None:
        tile_b = min(B, 256)
        # keep >= 2 batch tiles so a v7x second TensorCore gets work
        if tile_b == B and B >= 256 and B % 2 == 0:
            tile_b = B // 2
    assert B % tile_b == 0, (B, tile_b)
    assert tile_b == B or tile_b % 8 == 0, tile_b
    num_bt = B // tile_b

    w_itemsize = jnp.dtype(w_stack.dtype).itemsize
    resident_bytes = L * H * H * w_itemsize + L * H * 4
    weights_resident = resident_bytes <= 24 * 1024 * 1024  # leave VMEM headroom

    if weights_resident:
        w_spec = pl.BlockSpec((L, H, H), lambda i, l: (0, 0, 0))  # fetched once
        b_spec = pl.BlockSpec((L, 1, H), lambda i, l: (0, 0, 0))
        w_vmem = resident_bytes
    else:
        w_spec = pl.BlockSpec((1, H, H), lambda i, l: (l, 0, 0))  # streamed/layer
        b_spec = pl.BlockSpec((1, 1, H), lambda i, l: (l, 0, 0))
        w_vmem = 2 * (H * H * w_itemsize + H * 4)                 # double-buffered

    # Rough VMEM footprint: weights + double-buffered x + act scratch + small I/O.
    vmem_need = w_vmem + 2 * tile_b * H * 4 + tile_b * H * 4 + 4 * tile_b * 4
    params = dict(dimension_semantics=("parallel", "arbitrary"))
    if vmem_need > 30 * 1024 * 1024:
        params["vmem_limit_bytes"] = min(int(vmem_need * 5 // 4), 96 * 1024 * 1024)

    cost = pl.CostEstimate(
        flops=2 * B * L * H * H,
        transcendentals=B * H,  # exp in the CE epilogue
        bytes_accessed=(B * H * 4 + L * H * H * w_itemsize + L * H * 4
                        + B * 4 + B * 4),
    )

    kernel = functools.partial(fused_forward_kernel,
                               n_layers=L, weights_resident=weights_resident)

    per_example = pl.pallas_call(
        kernel,
        out_shape=jax.ShapeDtypeStruct((B, 1), jnp.float32),
        grid_spec=pltpu.PrefetchScalarGridSpec(
            num_scalar_prefetch=0,
            grid=(num_bt, L),
            in_specs=[
                pl.BlockSpec((tile_b, H), lambda i, l: (i, 0)),   # x
                pl.BlockSpec((tile_b, 1), lambda i, l: (i, 0)),   # labels
                w_spec,                                           # weights
                b_spec,                                           # biases
            ],
            out_specs=pl.BlockSpec((tile_b, 1), lambda i, l: (i, 0)),
            scratch_shapes=[pltpu.VMEM((tile_b, H), jnp.float32)],
        ),
        compiler_params=pltpu.CompilerParams(**params),
        cost_estimate=cost,
    )(x, y.reshape(B, 1).astype(jnp.int32), w_stack, b_stack)

    # Mean reduction (PyTorch CrossEntropyLoss default), outside the kernel so
    # parallel batch tiles never race on a shared accumulator.
    return jnp.mean(per_example)


if __name__ == "__main__":
    B = 256        # batch: 2 parallel tiles of 128
    H = 256        # h_dim (module default 1024; kept small for the demo)
    N_LAYERS = 2

    key = jax.random.PRNGKey(0)
    kx, ky, kw, kb = jax.random.split(key, 4)

    x = jax.random.normal(kx, (B, H), jnp.float32)
    y = jax.random.randint(ky, (B,), 0, H, jnp.int32)

    bound = 1.0 / jnp.sqrt(H)
    # PyTorch nn.Linear weight is [out, in]; store transposed [in, out], bf16.
    w_stack = jax.random.uniform(kw, (N_LAYERS, H, H), jnp.float32,
                                 -bound, bound).astype(jnp.bfloat16)
    b_stack = jax.random.uniform(kb, (N_LAYERS, 1, H), jnp.float32,
                                 -bound, bound)

    loss = jax.jit(nn_model_forward)(x, y, w_stack, b_stack)
    loss = jax.block_until_ready(loss)

    # Pure-JAX reference with identical (bf16-weight, f32-accumulate) semantics.
    h = x
    for l in range(N_LAYERS):
        h = jnp.dot(h.astype(jnp.bfloat16), w_stack[l],
                    preferred_element_type=jnp.float32) + b_stack[l, 0]
    lse = jax.scipy.special.logsumexp(h, axis=-1)
    ref_loss = jnp.mean(lse - h[jnp.arange(B), y])
    assert jnp.allclose(loss, ref_loss, atol=1e-3, rtol=1e-3), (loss, ref_loss)

    print("KERNEL_OK")
</pallas_src>

<mosaic_0001>
module attributes {stable_mosaic.version = 11 : i64} {
  func.func @fused_forward_kernel(%arg0: i32, %arg1: i32, %arg2: memref<128x256xf32, #tpu.memory_space<vmem>>, %arg3: memref<128x1xi32, #tpu.memory_space<vmem>>, %arg4: memref<2x256x256xbf16, #tpu.memory_space<vmem>>, %arg5: memref<2x1x256xf32, #tpu.memory_space<vmem>>, %arg6: memref<128x1xf32, #tpu.memory_space<vmem>>, %arg7: memref<128x256xf32, #tpu.memory_space<vmem>>) attributes {dimension_semantics = [#tpu.dimension_semantics<parallel>, #tpu.dimension_semantics<arbitrary>], iteration_bounds = array<i64: 2, 2>, scalar_prefetch = 0 : i64, scratch_operands = 1 : i64, tpu.core_type = #tpu.core_type<tc>, window_params = [{transform_indices = @transform_0, window_bounds = array<i64: 128, 256>}, {transform_indices = @transform_1, window_bounds = array<i64: 128, 1>}, {pipeline_mode = #tpu.pipeline_mode<synchronous>, transform_indices = @transform_2, window_bounds = array<i64: 2, 256, 256>}, {pipeline_mode = #tpu.pipeline_mode<synchronous>, transform_indices = @transform_3, window_bounds = array<i64: 2, 1, 256>}, {transform_indices = @transform_4, window_bounds = array<i64: 128, 1>}]} {
    %c0_i32 = arith.constant 0 : i32
    %0 = arith.cmpi eq, %arg1, %c0_i32 : i32
    %1 = arith.extui %0 : i1 to i32
    %c0_i32_0 = arith.constant 0 : i32
    %2 = arith.cmpi ne, %1, %c0_i32_0 : i32
    scf.if %2 {
      %c0_9 = arith.constant 0 : index
      %c0_10 = arith.constant 0 : index
      %18 = vector.load %arg2[%c0_9, %c0_10] : memref<128x256xf32, #tpu.memory_space<vmem>>, vector<128x256xf32>
      %c0_11 = arith.constant 0 : index
      %c0_12 = arith.constant 0 : index
      %19 = vector.load %arg7[%c0_11, %c0_12] : memref<128x256xf32, #tpu.memory_space<vmem>>, vector<128x256xf32>
      tpu.vector_store %arg7[%c0_11, %c0_12], %18 {strides = array<i32>} : memref<128x256xf32, #tpu.memory_space<vmem>>, vector<128x256xf32>,
    } else {
    }
    %3 = arith.index_cast %arg1 : i32 to index
    %c0 = arith.constant 0 : index
    %c0_1 = arith.constant 0 : index
    %4 = vector.load %arg4[%3, %c0, %c0_1] : memref<2x256x256xbf16, #tpu.memory_space<vmem>>, vector<1x256x256xbf16>
    %5 = vector.shape_cast %4 : vector<1x256x256xbf16> to vector<256x256xbf16>
    %6 = arith.index_cast %arg1 : i32 to index
    %c0_2 = arith.constant 0 : index
    %c0_3 = arith.constant 0 : index
    %7 = vector.load %arg5[%6, %c0_2, %c0_3] : memref<2x1x256xf32, #tpu.memory_space<vmem>>, vector<1x1x256xf32>
    %8 = vector.shape_cast %7 : vector<1x1x256xf32> to vector<1x256xf32>
    %c0_4 = arith.constant 0 : index
    %c0_5 = arith.constant 0 : index
    %9 = vector.load %arg7[%c0_4, %c0_5] : memref<128x256xf32, #tpu.memory_space<vmem>>, vector<128x256xf32>
    %10 = arith.truncf %9 : vector<128x256xf32> to vector<128x256xbf16>
    %cst = arith.constant dense<0.000000e+00> : vector<128x256xf32>
    %11 = tpu.matmul %10, %5, %cst {dimension_numbers = #tpu.dot_dimension_numbers<[1], [0], [0], [1], [0, 0, 1, 1], [], []>} : vector<128x256xbf16>, vector<256x256xbf16>, vector<128x256xf32> -> vector<128x256xf32>
    %12 = vector.broadcast %8 : vector<1x256xf32> to vector<128x256xf32>
    %13 = arith.addf %11, %12 : vector<128x256xf32>
    %c0_6 = arith.constant 0 : index
    %c0_7 = arith.constant 0 : index
    %14 = vector.load %arg7[%c0_6, %c0_7] : memref<128x256xf32, #tpu.memory_space<vmem>>, vector<128x256xf32>
    tpu.vector_store %arg7[%c0_6, %c0_7], %13 {strides = array<i32>} : memref<128x256xf32, #tpu.memory_space<vmem>>, vector<128x256xf32>,
    %c1_i32 = arith.constant 1 : i32
    %15 = arith.cmpi eq, %arg1, %c1_i32 : i32
    %16 = arith.extui %15 : i1 to i32
    %c0_i32_8 = arith.constant 0 : i32
    %17 = arith.cmpi ne, %16, %c0_i32_8 : i32
    scf.if %17 {
      %cst_9 = arith.constant dense<0xFF800000> : vector<128xf32>
      %18 = vector.multi_reduction <maximumf>, %13, %cst_9 [1] : vector<128x256xf32> to vector<128xf32>
      %19 = vector.shape_cast %18 : vector<128xf32> to vector<128x1xf32>
      %20 = vector.broadcast %19 : vector<128x1xf32> to vector<128x256xf32>
      %21 = arith.subf %13, %20 : vector<128x256xf32>
      %22 = math.exp %21 : vector<128x256xf32>
      %cst_10 = arith.constant dense<0.000000e+00> : vector<128xf32>
      %23 = vector.multi_reduction <add>, %22, %cst_10 [1] : vector<128x256xf32> to vector<128xf32>
      %24 = vector.shape_cast %23 : vector<128xf32> to vector<128x1xf32>
      %25 = math.log %24 : vector<128x1xf32>
      %26 = arith.addf %19, %25 : vector<128x1xf32>
      %c0_11 = arith.constant 0 : index
      %c0_12 = arith.constant 0 : index
      %27 = vector.load %arg3[%c0_11, %c0_12] : memref<128x1xi32, #tpu.memory_space<vmem>>, vector<128x1xi32>
      %28 = tpu.iota {dimensions = array<i32: 1>} : vector<128x256xi32>
      %29 = vector.broadcast %27 : vector<128x1xi32> to vector<128x256xi32>
      %30 = arith.cmpi eq, %28, %29 : vector<128x256xi32>
      %cst_13 = arith.constant 0.000000e+00 : f32
      %31 = vector.broadcast %cst_13 : f32 to vector<128x256xf32>
      %32 = arith.select %30, %13, %31 : vector<128x256xi1>, vector<128x256xf32>
      %cst_14 = arith.constant dense<0.000000e+00> : vector<128xf32>
      %33 = vector.multi_reduction <add>, %32, %cst_14 [1] : vector<128x256xf32> to vector<128xf32>
      %34 = vector.shape_cast %33 : vector<128xf32> to vector<128x1xf32>
      %35 = arith.subf %26, %34 : vector<128x1xf32>
      %c0_15 = arith.constant 0 : index
      %c0_16 = arith.constant 0 : index
      %36 = vector.load %arg6[%c0_15, %c0_16] : memref<128x1xf32, #tpu.memory_space<vmem>>, vector<128x1xf32>
      tpu.vector_store %arg6[%c0_15, %c0_16], %35 {strides = array<i32>} : memref<128x1xf32, #tpu.memory_space<vmem>>, vector<128x1xf32>,
    } else {
    }
    return
  }
  func.func @transform_0(%arg0: i32, %arg1: i32) -> (i32, i32) {
    %c0_i32 = arith.constant 0 : i32
    %c0_i32_0 = arith.constant 0 : i32
    return %arg0, %c0_i32 : i32, i32
  }
  func.func @transform_1(%arg0: i32, %arg1: i32) -> (i32, i32) {
    %c0_i32 = arith.constant 0 : i32
    %c0_i32_0 = arith.constant 0 : i32
    return %arg0, %c0_i32 : i32, i32
  }
  func.func @transform_2(%arg0: i32, %arg1: i32) -> (i32, i32, i32) {
    %c0_i32 = arith.constant 0 : i32
    %c0_i32_0 = arith.constant 0 : i32
    %c0_i32_1 = arith.constant 0 : i32
    %c0_i32_2 = arith.constant 0 : i32
    return %c0_i32, %c0_i32_0, %c0_i32_1 : i32, i32, i32
  }
  func.func @transform_3(%arg0: i32, %arg1: i32) -> (i32, i32, i32) {
    %c0_i32 = arith.constant 0 : i32
    %c0_i32_0 = arith.constant 0 : i32
    %c0_i32_1 = arith.constant 0 : i32
    %c0_i32_2 = arith.constant 0 : i32
    return %c0_i32, %c0_i32_0, %c0_i32_1 : i32, i32, i32
  }
  func.func @transform_4(%arg0: i32, %arg1: i32) -> (i32, i32) {
    %c0_i32 = arith.constant 0 : i32
    %c0_i32_0 = arith.constant 0 : i32
    return %arg0, %c0_i32 : i32, i32
  }
}

</mosaic_0001>

<bundles_post_ra>
// kernel: nn_model_forward.1
= control target key start
LH: loop header
LB: loop body
LE: loop exit
PB: predicated region body
PF: predicated region fallthrough
CT: control target
= control target key end

     0   :  { %9 = vsyncpa [#allocation4], 0  ;;  %s2459_s0 = inlined_call_operand.hbm [shape: f32[256,256], index: 0, kind: input, shape index: {}]   ;;  %s2460_s1 = inlined_call_operand.vmem [shape: s32[256,1], index: 1, kind: input, shape index: {}]   ;;  %s2461_s2 = inlined_call_operand.hbm [shape: bf16[2,256,256], index: 2, kind: input, shape index: {}]   ;;  %s2462_s3 = inlined_call_operand.vmem [shape: f32[2,1,256], index: 3, kind: input, shape index: {}]   ;;  %s2463_s4 = inlined_call_operand.vmem [shape: f32[256,1], index: 4, kind: output, shape index: {}]  }
   0x1   :  { %11 = vsyncpa [#allocation4 + $0x1], 0 }
   0x2   :  { %12 = vsyncpa [#allocation6], 0  ;;  %s1786_s15 = smov 0   ;;  %s1788_s16 = smov 0  }
   0x3   :  { %s1790_s17 = smov 0   ;;  %s1792_s18 = smov 0  }
   0x4   :  { %s1794_s19 = smov 0   ;;  %s1796_s20 = smov 0  }
   0x5   :  { %s1798_s21 = smov 0   ;;  %s1800_s22 = smov 0  }
   0x6 LB: > { %s1301_s23 = sadd.s32 4294967295, %s1752_s22   ;;  %p50_p0 = scmp.ne.s32.totalorder %s1728_s16, %s1724_s15  ;;  %s1752_s22 = sphi %s1800_s22, %s18_s22   ;;  %s1748_s21 = sphi %s1798_s21, %s2488_s21   ;;  %s1744_s20 = sphi %s1796_s20, %s2487_s20   ;;  %s1740_s19 = sphi %s1794_s19, %s2486_s19   ;;  %s1736_s18 = sphi %s1792_s18, %s2485_s18   ;;  %s1732_s17 = sphi %s1790_s17, %s2484_s17   ;;  %s1728_s16 = sphi %s1788_s16, %s2483_s16   ;;  %s1724_s15 = sphi %s1786_s15, %s2482_s15  }
   0x7   : > { %p1826_p1 = scmp.eq.s32.totalorder %s1301_s23, 0  ;;  %p1303_p2 = scmp.ge.s32.totalorder %s1752_s22, 1 }
   0x8   : > { %p155_p3 = scmp.lt.s32.totalorder %s1752_s22, 5  ;;  %s1754_s27 = smov [#allocation5]  }
   0x9   : > { %s2470_s24 = scalar_select %p1826_p1, 1, 0 }
   0xa   : > { %p1834_p4 = por %p1826_p1, %p50_p0  ;;  %p1838_p5 = pnand %p1303_p2, %p155_p3 }
   0xb   : > { %s167_s28 = sshll.u32 %s1754_s27, 4  ;;  %s1624_s6 = scalar_lea.hbm %s2461_s2, 8192  ;;  %s168_s28 = int_to_ptr.vmem [resolvable:$true] %s167_s28 }
   0xc   : > { %s2471_s25 = scalar_select %p1834_p4, 1, 0 }
   0xd   : > { %s2472_s26 = scalar_select %p1838_p5, 1, 0 }
   0xe   : > { %p1397_p6 = pneg %p1838_p5  ;;  %p1625_p8 = scmp.ne.s32.totalorder %s2461_s2, %s1624_s6 }
   0xf   : > { %p1631_p12 = scmp.lt.u32.totalorder %s1624_s6, %s2461_s2 }
  0x10   : > { %p1846_p7 = pnand %p1397_p6, %p1826_p1 }
  0x12   : > { %p1626_p9 = pneg %p1846_p7 }
  0x14   : > { %p1627_p10 = pnand %p1626_p9, %p1625_p8 }
  0x16   : > { %p1628_p11 = pneg %p1627_p10 }
  0x18   : > { %p1633_p13 = pnand %p1631_p12, %p1628_p11 }
  0x1a   : > { %1636 = shalt.err (!%p1633_p13)
}
  0x1b   : > { %s1637_s11 = scalar_lea.vmem %s168_s28, 8192  ;;  %p1645_p6 = scmp.lt.s32.totalorder %s168_s28, %s168_s28 }
  0x1c   : > { %p1638_p0 = scmp.ne.s32.totalorder %s168_s28, %s1637_s11  ;;  %p1646_p1 = scmp.lt.s32.totalorder %s1637_s11, %s1637_s11 }
  0x1e   : > { %p1640_p2 = pnand %p1638_p0, %p1626_p9  ;;  %p1647_p4 = por %p1646_p1, %p1645_p6 }
  0x20   : > { %p1641_p3 = pneg %p1640_p2 }
  0x22   : > { %p1648_p5 = pnand %p1647_p4, %p1641_p3 }
  0x24   : > { %1651 = shalt.err (!%p1648_p5)
}
  0x25   : > { %s1755_s12 = smov 128   ;;  %s1756_s13 = smov 8  }
  0x26   : > { %1400 = dma.hbm_to_vmem [thread:$0]  (!%p1846_p7), %s2461_s2, 8192, %s168_s28, [#allocation6], %s1755_s12, %s1755_s12, %s1756_s13  }
  0x27   : > { %s27_s23 = sadd.s32 1, %s1744_s20  ;;  %s30_s27 = sadd.s32 1, %s1748_s21 }
  0x28   : > { %p28_p1 = scmp.ge.s32.totalorder %s27_s23, 2  ;;  %s37_s30 = sadd.s32 1, %s1732_s17 }
  0x29   : > { %p44_p4 = scmp.ne.s32.totalorder %s1732_s17, %s1728_s16  ;;  %p45_p5 = scmp.eq.s32.totalorder %s1752_s22, 0 }
  0x2a   : > { %s2490_s23 = smov (%p28_p1, %s27_s23), 0  ;;  %s2492_s27 = smov (!%p28_p1, %s30_s27), %s1748_s21 }
  0x2b   : > { %p1406_p8 = scmp.lt.s32.totalorder %s1752_s22, 4  ;;  %p32_p9 = scmp.ge.s32.totalorder %s2492_s27, 2 }
  0x2c   : > { %s184_s5 = sand.u32 1, %s1732_s17   ;;  %p46_p10 = por %p45_p5, %p44_p4 }
  0x2d   : > { %s2494_s27 = smov (%p32_p9, %s2492_s27), 0  ;;  %s1306_s29 = sshll.u32 %s184_s5, 8 }
  0x2e   : > { %s1357_s28 = sshll.u32 %s1748_s21, 12  ;;  %s34_s6 = ssub.s32 %s1748_s21, %s2494_s27 }
  0x2f   : > { %p35_p7 = scmp.eq.s32.totalorder %s34_s6, 0  ;;  %s1885_s9 = scalar_lea.hbm %s2459_s0, %s1357_s28 }
  0x30   : > { %s188_s10 = scalar_lea.vmem [#allocation3], %s1306_s29  ;;  %p1887_p11 = pnand %p1406_p8, %p46_p10 }
  0x31   : > { %s196_s11 = sshll.u32 %s188_s10, 4  ;;  %s1896_s14 = scalar_lea.sflag [#allocation4], %s184_s5  ;;  %s1894_s11 = int_to_ptr.vmem [resolvable:$true] %s196_s11 }
  0x32   : > { %s1892_s13 = scalar_select %p35_p7, %s1732_s17, %s37_s30  }
  0x33   : > { %s1652_s15 = scalar_lea.hbm %s1885_s9, 4096  ;;  %p1654_p13 = pneg %p1887_p11 }
  0x34   : > { %p1653_p12 = scmp.ne.s32.totalorder %s1885_s9, %s1652_s15  ;;  %s1657_s6 = scalar_lea.hbm %s2459_s0, 8192 }
  0x35   : > { %p1658_p3 = scmp.lt.u32.totalorder %s1885_s9, %s2459_s0  ;;  %p1659_p6 = scmp.lt.u32.totalorder %s1657_s6, %s1652_s15 }
  0x36   : > { %p1655_p0 = pnand %p1654_p13, %p1653_p12  ;;  %p1661_p4 = scmp.lt.u32.totalorder %s1652_s15, %s1885_s9 }
  0x37   : > { %p1660_p1 = por %p1659_p6, %p1658_p3 }
  0x38   : > { %p1656_p2 = pneg %p1655_p0 }
  0x39   : > { %p1662_p5 = por %p1661_p4, %p1660_p1 }
  0x3b   : > { %p1663_p8 = pnand %p1662_p5, %p1656_p2 }
  0x3d   : > { %1666 = shalt.err (!%p1663_p8)
}
  0x3e   : > { %s1667_s30 = scalar_lea.vmem %s1894_s11, 4096  ;;  %s1757_s5 = smov [#allocation3]  }
  0x3f   : > { %p1668_p9 = scmp.ne.s32.totalorder %s1894_s11, %s1667_s30  ;;  %s1672_s10 = sshll.u32 %s1757_s5, 4  ;;  %s1673_s10 = int_to_ptr.vmem [resolvable:$false] %s1672_s10 }
  0x40   : > { %s1674_s29 = scalar_lea.vmem %s1673_s10, 8192  ;;  %p1675_p12 = scmp.lt.s32.totalorder %s1894_s11, %s1673_s10 }
  0x41   : > { %p1670_p10 = pnand %p1668_p9, %p1654_p13  ;;  %p1676_p0 = scmp.lt.s32.totalorder %s1674_s29, %s1667_s30 }
  0x43   : > { %p1671_p7 = pneg %p1670_p10  ;;  %p1677_p3 = por %p1676_p0, %p1675_p12 }
  0x45   : > { %p1678_p6 = pnand %p1677_p3, %p1671_p7 }
  0x47   : > { %1681 = shalt.err (!%p1678_p6)
}
  0x48   : > { %s1758_s15 = smov 256   ;;  %s1759_s28 = smov 16  }
  0x49   : > { %1404 = dma.hbm_to_vmem [thread:$0]  (!%p1887_p11), %s1885_s9, 4096, %s1894_s11, %s1896_s14, %s1758_s15, %s1758_s15, %s1759_s28  }
  0x4a   : > { %p2475_p13 = scmp.ne.s32.totalorder %s2472_s26, 0 }
  0x4b   : > { %s219_s6 = sand.u32 (!%p2475_p13), 1, %s1728_s16   ;;  %p2476_p2 = scmp.ne.s32.totalorder (!%p2475_p13), %s2471_s25, 0 }
  0x4c   : > { %217 = sbr.rel (%p2475_p13) target bundleno = 809 (0x329), region = 36  ;;  %s1311_s7 = sshll.u32 (!%p2475_p13), %s219_s6, 8 }
  0x4d   : > { %s220_s8 = scalar_lea.sflag (!%p2475_p13), [#allocation4], %s219_s6  ;;  %s1927_s30 = scalar_lea.vmem (!%p2475_p13), [#allocation3], %s1311_s7 }
  0x53   : > { %1715 = dma.done.wait (%p2476_p2), %s220_s8, 4096  }
  0x54   : > { %1717 = vsyncadd (%p2476_p2), %s220_s8, 4294963200  ;;  %p2477_p1 = scmp.ne.s32.totalorder %s2470_s24, 0 }
  0x56   : > { %1719 = dma.done.wait (%p2477_p1), [#allocation6], 8192  }
  0x57   : > { %1721 = vsyncadd (%p2477_p1), [#allocation6], 4294959104  ;;  %s1313_s26 = sshll.u32 %s1740_s19, 4  ;;  %p1317_p4 = scmp.ne.s32.totalorder %s1736_s18, 0 }
  0x58   : > { %p259_p11 = scmp.lt.s32.totalorder %s1313_s26, 31  ;;  %v274_v0 = vld [vmem:[%s1927_s30] sm:$0xff] (!%p1317_p4)  ;;  %v275_v1 = vld [vmem:[%s1927_s30 + $0x8] sm:$0xff] (!%p1317_p4)  ;;  %v276_v2 = vld [vmem:[%s1927_s30 + $0x10] sm:$0xff] (!%p1317_p4) }
  0x59   : > { %273 = sbr.rel (%p1317_p4) target bundleno = 105 (0x69), region = 48  ;;  %306 = vst [vmem:[#allocation2] sm:$0xff] (!%p1317_p4), %v274_v0  ;;  %307 = vst [vmem:[#allocation2 + $0x8] sm:$0xff] (!%p1317_p4), %v275_v1  ;;  %v277_v3 = vld [vmem:[%s1927_s30 + $0x18] sm:$0xff] (!%p1317_p4)  ;;  %v278_v4 = vld [vmem:[%s1927_s30 + $0x20] sm:$0xff] (!%p1317_p4) }
  0x5a   : > { %s2496_s26 = smov (!%p259_p11, %s1313_s26), 31  ;;  %308 = vst [vmem:[#allocation2 + $0x10] sm:$0xff] (!%p1317_p4), %v276_v2  ;;  %v279_v5 = vld [vmem:[%s1927_s30 + $0x28] sm:$0xff] (!%p1317_p4)  ;;  %309 = vst [vmem:[#allocation2 + $0x18] sm:$0xff] (!%p1317_p4), %v277_v3  ;;  %v280_v6 = vld [vmem:[%s1927_s30 + $0x30] sm:$0xff] (!%p1317_p4) }
  0x5b   : > { %s1314_s9 = sshll.u32 %s2496_s26, 3  ;;  %310 = vst [vmem:[#allocation2 + $0x20] sm:$0xff] (!%p1317_p4), %v278_v4  ;;  %311 = vst [vmem:[#allocation2 + $0x28] sm:$0xff] (!%p1317_p4), %v279_v5  ;;  %v281_v7 = vld [vmem:[%s1927_s30 + $0x38] sm:$0xff] (!%p1317_p4)  ;;  %v282_v8 = vld [vmem:[%s1927_s30 + $0x40] sm:$0xff] (!%p1317_p4) }
  0x5c   : > { %s1941_s14 = scalar_lea.vmem %s2460_s1, %s1314_s9  ;;  %s1946_s25 = scalar_lea.vmem %s2463_s4, %s1314_s9  ;;  %312 = vst [vmem:[#allocation2 + $0x30] sm:$0xff] (!%p1317_p4), %v280_v6  ;;  %313 = vst [vmem:[#allocation2 + $0x38] sm:$0xff] (!%p1317_p4), %v281_v7  ;;  %v283_v9 = vld [vmem:[%s1927_s30 + $0x48] sm:$0xff] (!%p1317_p4)  ;;  %v284_v10 = vld [vmem:[%s1927_s30 + $0x50] sm:$0xff] (!%p1317_p4) }
  0x5d   : > { %314 = vst [vmem:[#allocation2 + $0x40] sm:$0xff] (!%p1317_p4), %v282_v8  ;;  %v285_v11 = vld [vmem:[%s1927_s30 + $0x58] sm:$0xff] (!%p1317_p4)  ;;  %315 = vst [vmem:[#allocation2 + $0x48] sm:$0xff] (!%p1317_p4), %v283_v9  ;;  %v286_v12 = vld [vmem:[%s1927_s30 + $0x60] sm:$0xff] (!%p1317_p4) }
  0x5e   : > { %316 = vst [vmem:[#allocation2 + $0x50] sm:$0xff] (!%p1317_p4), %v284_v10  ;;  %317 = vst [vmem:[#allocation2 + $0x58] sm:$0xff] (!%p1317_p4), %v285_v11  ;;  %v287_v13 = vld [vmem:[%s1927_s30 + $0x68] sm:$0xff] (!%p1317_p4)  ;;  %v288_v14 = vld [vmem:[%s1927_s30 + $0x70] sm:$0xff] (!%p1317_p4) }
  0x5f   : > { %318 = vst [vmem:[#allocation2 + $0x60] sm:$0xff] (!%p1317_p4), %v286_v12  ;;  %319 = vst [vmem:[#allocation2 + $0x68] sm:$0xff] (!%p1317_p4), %v287_v13  ;;  %v289_v15 = vld [vmem:[%s1927_s30 + $0x78] sm:$0xff] (!%p1317_p4)  ;;  %v290_v16 = vld [vmem:[%s1927_s30 + $0x80] sm:$0xff] (!%p1317_p4) }
  0x60   : > { %320 = vst [vmem:[#allocation2 + $0x70] sm:$0xff] %v288_v14  ;;  %v291_v17 = vld [vmem:[%s1927_s30 + $0x88] sm:$0xff]  ;;  %321 = vst [vmem:[#allocation2 + $0x78] sm:$0xff] %v289_v15  ;;  %v292_v18 = vld [vmem:[%s1927_s30 + $0x90] sm:$0xff] }
  0x61   : > { %322 = vst [vmem:[#allocation2 + $0x80] sm:$0xff] %v290_v16  ;;  %323 = vst [vmem:[#allocation2 + $0x88] sm:$0xff] %v291_v17  ;;  %v293_v19 = vld [vmem:[%s1927_s30 + $0x98] sm:$0xff]  ;;  %v294_v20 = vld [vmem:[%s1927_s30 + $0xa0] sm:$0xff] }
  0x62   : > { %324 = vst [vmem:[#allocation2 + $0x90] sm:$0xff] %v292_v18  ;;  %325 = vst [vmem:[#allocation2 + $0x98] sm:$0xff] %v293_v19  ;;  %v295_v21 = vld [vmem:[%s1927_s30 + $0xa8] sm:$0xff]  ;;  %v296_v22 = vld [vmem:[%s1927_s30 + $0xb0] sm:$0xff] }
  0x63   : > { %326 = vst [vmem:[#allocation2 + $0xa0] sm:$0xff] %v294_v20  ;;  %v297_v23 = vld [vmem:[%s1927_s30 + $0xb8] sm:$0xff]  ;;  %327 = vst [vmem:[#allocation2 + $0xa8] sm:$0xff] %v295_v21  ;;  %v298_v24 = vld [vmem:[%s1927_s30 + $0xc0] sm:$0xff] }
  0x64   : > { %328 = vst [vmem:[#allocation2 + $0xb0] sm:$0xff] %v296_v22  ;;  %329 = vst [vmem:[#allocation2 + $0xb8] sm:$0xff] %v297_v23  ;;  %v299_v25 = vld [vmem:[%s1927_s30 + $0xc8] sm:$0xff]  ;;  %v300_v26 = vld [vmem:[%s1927_s30 + $0xd0] sm:$0xff] }
  0x65   : > { %330 = vst [vmem:[#allocation2 + $0xc0] sm:$0xff] %v298_v24  ;;  %331 = vst [vmem:[#allocation2 + $0xc8] sm:$0xff] %v299_v25  ;;  %v301_v27 = vld [vmem:[%s1927_s30 + $0xd8] sm:$0xff]  ;;  %v302_v28 = vld [vmem:[%s1927_s30 + $0xe0] sm:$0xff] }
  0x66   : > { %332 = vst [vmem:[#allocation2 + $0xd0] sm:$0xff] %v300_v26  ;;  %v303_v29 = vld [vmem:[%s1927_s30 + $0xe8] sm:$0xff]  ;;  %333 = vst [vmem:[#allocation2 + $0xd8] sm:$0xff] %v301_v27  ;;  %v304_v30 = vld [vmem:[%s1927_s30 + $0xf0] sm:$0xff] }
  0x67   : > { %334 = vst [vmem:[#allocation2 + $0xe0] sm:$0xff] %v302_v28  ;;  %335 = vst [vmem:[#allocation2 + $0xe8] sm:$0xff] %v303_v29  ;;  %v305_v31 = vld [vmem:[%s1927_s30 + $0xf8] sm:$0xff] }
  0x68   : > { %336 = vst [vmem:[#allocation2 + $0xf0] sm:$0xff] %v304_v30  ;;  %337 = vst [vmem:[#allocation2 + $0xf8] sm:$0xff] %v305_v31 }
  0x69 PF: > { %s1358_s19 = sshll.u32 %s1736_s18, 8  ;;  %v377_v32 = vld [vmem:[#allocation2 + $0x8] sm:$0xff]  ;;  %v395_v36 = vld [vmem:[#allocation2 + $0x98] sm:$0xff]  ;;  %v376_v6 = vld [vmem:[#allocation2] sm:$0xff]  ;;  %s1320_s29 = sshll.u32 %s1736_s18, 1 }
  0x6a   : > { %v379_v33 = vld [vmem:[#allocation2 + $0x18] sm:$0xff]  ;;  %v393_v34 = vld [vmem:[#allocation2 + $0x88] sm:$0xff]  ;;  %s1982_s24 = scalar_lea.vmem [#allocation5], %s1358_s19  ;;  %v378_v7 = vld [vmem:[#allocation2 + $0x10] sm:$0xff]  ;;  %s374_s6 = scalar_lea.vmem %s2462_s3, %s1320_s29 }
  0x6b   : > { %v409_v35 = vpack.c.bf16 %v379_v33, %v377_v32  ;;  %v1478_v37 = vld [vmem:[%s1982_s24 + $0x4] ss:$8 sps:$4 sm:$0xff]   ;;  %v1480_v38 = vld [vmem:[%s1982_s24] ss:$8 sps:$4 sm:$0xff]   ;;  %v417_v39 = vpack.c.bf16 %v395_v36, %v393_v34  ;;  %v1481_v40 = vld [vmem:[%s1982_s24 + $0x14] ss:$8 sps:$4 sm:$0xff]   ;;  %v408_v14 = vpack.c.bf16 %v378_v7, %v376_v6 }
  0x6c   : > { %595 = vmatprep.subr.bf16.mxu0 %v1478_v37  ;;  %1359 = vmatprep.subr.bf16.mxu1 %v1478_v37  ;;  %v1483_v41 = vld [vmem:[%s1982_s24 + $0x10] ss:$8 sps:$4 sm:$0xff]   ;;  %v1484_v42 = vld [vmem:[%s1982_s24 + $0x24] ss:$8 sps:$4 sm:$0xff]   ;;  %v1486_v43 = vld [vmem:[%s1982_s24 + $0x20] ss:$8 sps:$4 sm:$0xff]  }
  0x6d   : > { %627 = vmatprep.mubr.bf16.mxu0 %v409_v35  ;;  %596 = vmatpush1.bf16.msra.mxu0 %v1480_v38  ;;  %v1487_v44 = vld [vmem:[%s1982_s24 + $0x34] ss:$8 sps:$4 sm:$0xff]   ;;  %v1489_v45 = vld [vmem:[%s1982_s24 + $0x30] ss:$8 sps:$4 sm:$0xff]   ;;  %v1490_v46 = vld [vmem:[%s1982_s24 + $0x44] ss:$8 sps:$4 sm:$0xff]  }
  0x6e   : > { %1375 = vmatpush1.bf16.msra.mxu1 %v1480_v38  ;;  %597 = vmatprep.subr.bf16.mxu0 %v1481_v40  ;;  %v1492_v47 = vld [vmem:[%s1982_s24 + $0x40] ss:$8 sps:$4 sm:$0xff]   ;;  %v1493_v48 = vld [vmem:[%s1982_s24 + $0x54] ss:$8 sps:$4 sm:$0xff]   ;;  %v1495_v49 = vld [vmem:[%s1982_s24 + $0x50] ss:$8 sps:$4 sm:$0xff]  }
  0x6f   : > { %1360 = vmatprep.subr.bf16.mxu1 %v1481_v40  ;;  %667 = vmatprep.mubr.bf16.mxu1 %v417_v39  ;;  %v1496_v50 = vld [vmem:[%s1982_s24 + $0x64] ss:$8 sps:$4 sm:$0xff]   ;;  %v1498_v51 = vld [vmem:[%s1982_s24 + $0x60] ss:$8 sps:$4 sm:$0xff]   ;;  %v1499_v52 = vld [vmem:[%s1982_s24 + $0x74] ss:$8 sps:$4 sm:$0xff]  }
  0x70   : > { %v1501_v53 = vld [vmem:[%s1982_s24 + $0x70] ss:$8 sps:$4 sm:$0xff]   ;;  %v1502_v54 = vld [vmem:[%s1982_s24 + $0x84] ss:$8 sps:$4 sm:$0xff]   ;;  %v1504_v55 = vld [vmem:[%s1982_s24 + $0x80] ss:$8 sps:$4 sm:$0xff]  }
  0x71   : > { %598 = vmatpush1.bf16.msra.mxu0 %v1483_v41  ;;  %v1505_v56 = vld [vmem:[%s1982_s24 + $0x94] ss:$8 sps:$4 sm:$0xff]   ;;  %v1507_v57 = vld [vmem:[%s1982_s24 + $0x90] ss:$8 sps:$4 sm:$0xff]   ;;  %v1508_v58 = vld [vmem:[%s1982_s24 + $0xa4] ss:$8 sps:$4 sm:$0xff]  }
  0x72   : > { %1376 = vmatpush1.bf16.msra.mxu1 %v1483_v41  ;;  %599 = vmatprep.subr.bf16.mxu0 %v1484_v42  ;;  %v1510_v59 = vld [vmem:[%s1982_s24 + $0xa0] ss:$8 sps:$4 sm:$0xff]   ;;  %v1511_v60 = vld [vmem:[%s1982_s24 + $0xb4] ss:$8 sps:$4 sm:$0xff]   ;;  %v1513_v61 = vld [vmem:[%s1982_s24 + $0xb0] ss:$8 sps:$4 sm:$0xff]  }
  0x73   : > { %1361 = vmatprep.subr.bf16.mxu1 %v1484_v42  ;;  %v1514_v62 = vld [vmem:[%s1982_s24 + $0xc4] ss:$8 sps:$4 sm:$0xff]   ;;  %v1516_v63 = vld [vmem:[%s1982_s24 + $0xc0] ss:$8 sps:$4 sm:$0xff]   ;;  %v1517_v0 = vld [vmem:[%s1982_s24 + $0xd4] ss:$8 sps:$4 sm:$0xff]  }
  0x74   : > { %v1519_v1 = vld [vmem:[%s1982_s24 + $0xd0] ss:$8 sps:$4 sm:$0xff]   ;;  %v1520_v2 = vld [vmem:[%s1982_s24 + $0xe4] ss:$8 sps:$4 sm:$0xff]   ;;  %v1522_v3 = vld [vmem:[%s1982_s24 + $0xe0] ss:$8 sps:$4 sm:$0xff]  }
  0x75   : > { %600 = vmatpush1.bf16.msra.mxu0 %v1486_v43  ;;  %v1523_v4 = vld [vmem:[%s1982_s24 + $0xf4] ss:$8 sps:$4 sm:$0xff]   ;;  %v1525_v5 = vld [vmem:[%s1982_s24 + $0xf0] ss:$8 sps:$4 sm:$0xff]   ;;  %v392_v8 = vld [vmem:[#allocation2 + $0x80] sm:$0xff]  ;;  %p1353_p5 = scmp.ne.s32.totalorder %s1736_s18, 1 }
  0x76   : > { %1377 = vmatpush1.bf16.msra.mxu1 %v1486_v43  ;;  %601 = vmatprep.subr.bf16.mxu0 %v1487_v44  ;;  %v394_v9 = vld [vmem:[#allocation2 + $0x90] sm:$0xff]  ;;  %v381_v10 = vld [vmem:[#allocation2 + $0x28] sm:$0xff]  ;;  %v383_v11 = vld [vmem:[#allocation2 + $0x38] sm:$0xff] }
  0x77   : > { %1362 = vmatprep.subr.bf16.mxu1 %v1487_v44  ;;  %v397_v12 = vld [vmem:[#allocation2 + $0xa8] sm:$0xff]  ;;  %v399_v13 = vld [vmem:[#allocation2 + $0xb8] sm:$0xff]  ;;  %v416_v15 = vpack.c.bf16 %v394_v9, %v392_v8  ;;  %v411_v16 = vpack.c.bf16 %v383_v11, %v381_v10  ;;  %v380_v18 = vld [vmem:[#allocation2 + $0x20] sm:$0xff] }
  0x78   : > { %v419_v17 = vpack.c.bf16 %v399_v13, %v397_v12  ;;  %v382_v19 = vld [vmem:[#allocation2 + $0x30] sm:$0xff]  ;;  %v396_v20 = vld [vmem:[#allocation2 + $0xa0] sm:$0xff]  ;;  %v385_v22 = vld [vmem:[#allocation2 + $0x48] sm:$0xff] }
  0x79   : > { %602 = vmatpush1.bf16.msra.mxu0 %v1489_v45  ;;  %v398_v21 = vld [vmem:[#allocation2 + $0xb0] sm:$0xff]  ;;  %v387_v23 = vld [vmem:[#allocation2 + $0x58] sm:$0xff]  ;;  %v401_v24 = vld [vmem:[#allocation2 + $0xc8] sm:$0xff]  ;;  %v410_v26 = vpack.c.bf16 %v382_v19, %v380_v18 }
  0x7a   : > { %1378 = vmatpush1.bf16.msra.mxu1 %v1489_v45  ;;  %603 = vmatprep.subr.bf16.mxu0 %v1490_v46  ;;  %v403_v25 = vld [vmem:[#allocation2 + $0xd8] sm:$0xff]  ;;  %v418_v27 = vpack.c.bf16 %v398_v21, %v396_v20  ;;  %v413_v28 = vpack.c.bf16 %v387_v23, %v385_v22  ;;  %v384_v30 = vld [vmem:[#allocation2 + $0x40] sm:$0xff]  ;;  %v386_v31 = vld [vmem:[#allocation2 + $0x50] sm:$0xff] }
  0x7b   : > { %1363 = vmatprep.subr.bf16.mxu1 %v1490_v46  ;;  %v421_v29 = vpack.c.bf16 %v403_v25, %v401_v24  ;;  %v400_v32 = vld [vmem:[#allocation2 + $0xc0] sm:$0xff]  ;;  %v402_v33 = vld [vmem:[#allocation2 + $0xd0] sm:$0xff]  ;;  %v389_v34 = vld [vmem:[#allocation2 + $0x68] sm:$0xff]  ;;  %v412_v38 = vpack.c.bf16 %v386_v31, %v384_v30 }
  0x7c   : > { %v391_v35 = vld [vmem:[#allocation2 + $0x78] sm:$0xff]  ;;  %v405_v36 = vld [vmem:[#allocation2 + $0xe8] sm:$0xff]  ;;  %v420_v39 = vpack.c.bf16 %v402_v33, %v400_v32  ;;  %v388_v42 = vld [vmem:[#allocation2 + $0x60] sm:$0xff] }
  0x7d   : > { %604 = vmatpush1.bf16.msra.mxu0 %v1492_v47  ;;  %v407_v37 = vld [vmem:[#allocation2 + $0xf8] sm:$0xff]  ;;  %v415_v40 = vpack.c.bf16 %v391_v35, %v389_v34  ;;  %v390_v43 = vld [vmem:[#allocation2 + $0x70] sm:$0xff]  ;;  %v404_v44 = vld [vmem:[#allocation2 + $0xe0] sm:$0xff] }
  0x7e   : > { %1379 = vmatpush1.bf16.msra.mxu1 %v1492_v47  ;;  %605 = vmatprep.subr.bf16.mxu0 %v1493_v48  ;;  %v423_v41 = vpack.c.bf16 %v407_v37, %v405_v36  ;;  %v406_v45 = vld [vmem:[#allocation2 + $0xf0] sm:$0xff]  ;;  %v414_v46 = vpack.c.bf16 %v390_v43, %v388_v42 }
  0x7f   : > { %1364 = vmatprep.subr.bf16.mxu1 %v1493_v48  ;;  %v422_v47 = vpack.c.bf16 %v406_v45, %v404_v44  ;;  %v425_v48 = vlaneseq }
  0x81   : > { %606 = vmatpush1.bf16.msra.mxu0 %v1495_v49 }
  0x82   : > { %1380 = vmatpush1.bf16.msra.mxu1 %v1495_v49  ;;  %607 = vmatprep.subr.bf16.mxu0 %v1496_v50  ;;  %v426_v49 = vshrl.u32 %v425_v48, 7 }
  0x83   : > { %1365 = vmatprep.subr.bf16.mxu1 %v1496_v50 }
  0x84   : > { %v427_v50 = vsub.s32 0, %v426_v49 }
  0x85   : > { %608 = vmatpush1.bf16.msra.mxu0 %v1498_v51 }
  0x86   : > { %1381 = vmatpush1.bf16.msra.mxu1 %v1498_v51  ;;  %609 = vmatprep.subr.bf16.mxu0 %v1499_v52  ;;  %v375_v51 = vld [vmem:[%s374_s6] sm:$0x3] }
  0x87   : > { %1366 = vmatprep.subr.bf16.mxu1 %v1499_v52  ;;  %v431_v52 = vsub.s32 1, %v426_v49 }
  0x89   : > { %610 = vmatpush1.bf16.msra.mxu0 %v1501_v53 }
  0x8a   : > { %1382 = vmatpush1.bf16.msra.mxu1 %v1501_v53  ;;  %611 = vmatprep.subr.bf16.mxu0 %v1502_v54  ;;  %v2021_v53 = vrot.slane %v375_v51, %v427_v50 }
  0x8b   : > { %1367 = vmatprep.subr.bf16.mxu1 %v1502_v54  ;;  %v2023_v54 = vrot.slane %v375_v51, %v431_v52 }
  0x8d   : > { %612 = vmatpush1.bf16.msra.mxu0 %v1504_v55 }
  0x8e   : > { %1383 = vmatpush1.bf16.msra.mxu1 %v1504_v55  ;;  %613 = vmatprep.subr.bf16.mxu0 %v1505_v56 }
  0x8f   : > { %1368 = vmatprep.subr.bf16.mxu1 %v1505_v56 }
  0x91   : > { %614 = vmatpush1.bf16.msra.mxu0 %v1507_v57 }
  0x92   : > { %1384 = vmatpush1.bf16.msra.mxu1 %v1507_v57  ;;  %615 = vmatprep.subr.bf16.mxu0 %v1508_v58 }
  0x93   : > { %1369 = vmatprep.subr.bf16.mxu1 %v1508_v58 }
  0x95   : > { %616 = vmatpush1.bf16.msra.mxu0 %v1510_v59 }
  0x96   : > { %1385 = vmatpush1.bf16.msra.mxu1 %v1510_v59  ;;  %617 = vmatprep.subr.bf16.mxu0 %v1511_v60 }
  0x97   : > { %1370 = vmatprep.subr.bf16.mxu1 %v1511_v60 }
  0x99   : > { %618 = vmatpush1.bf16.msra.mxu0 %v1513_v61 }
  0x9a   : > { %1386 = vmatpush1.bf16.msra.mxu1 %v1513_v61  ;;  %619 = vmatprep.subr.bf16.mxu0 %v1514_v62 }
  0x9b   : > { %1371 = vmatprep.subr.bf16.mxu1 %v1514_v62 }
  0x9d   : > { %620 = vmatpush1.bf16.msra.mxu0 %v1516_v63 }
  0x9e   : > { %1387 = vmatpush1.bf16.msra.mxu1 %v1516_v63  ;;  %621 = vmatprep.subr.bf16.mxu0 %v1517_v0 }
  0x9f   : > { %1372 = vmatprep.subr.bf16.mxu1 %v1517_v0 }
  0xa1   : > { %622 = vmatpush1.bf16.msra.mxu0 %v1519_v1 }
  0xa2   : > { %1388 = vmatpush1.bf16.msra.mxu1 %v1519_v1  ;;  %623 = vmatprep.subr.bf16.mxu0 %v1520_v2 }
  0xa3   : > { %1373 = vmatprep.subr.bf16.mxu1 %v1520_v2 }
  0xa5   : > { %624 = vmatpush1.bf16.msra.mxu0 %v1522_v3 }
  0xa6   : > { %1389 = vmatpush1.bf16.msra.mxu1 %v1522_v3  ;;  %625 = vmatprep.subr.bf16.mxu0 %v1523_v4 }
  0xa7   : > { %1374 = vmatprep.subr.bf16.mxu1 %v1523_v4 }
  0xa9   : > { %626 = vmatpush1.bf16.msra.mxu0 %v1525_v5 }
  0xaa   : > { %1390 = vmatpush1.bf16.msra.mxu1 %v1525_v5 }
  0xac   : > { %628 = vmatmul.mubr.bf16.vlgmr.msra.gmra.mrb[0].mxu0 %v408_v14 }
  0xad   : > { %668 = vmatmul.mubr.bf16.vlgmr.msra.gmra.mrb[0].mxu1 %v416_v15  ;;  %637 = vmatprep.mubr.bf16.mxu0 %v411_v16 }
  0xae   : > { %677 = vmatprep.mubr.bf16.mxu1 %v419_v17 }
  0xb4   : > { %638 = vmatmul.mubr.bf16.gmra.mrb[4].mxu0 %v410_v26 }
  0xb5   : > { %678 = vmatmul.mubr.bf16.gmra.mrb[4].mxu1 %v418_v27  ;;  %647 = vmatprep.mubr.bf16.mxu0 %v413_v28 }
  0xb6   : > { %687 = vmatprep.mubr.bf16.mxu1 %v421_v29 }
  0xbc   : > { %648 = vmatmul.mubr.bf16.gmra.mrb[8].mxu0 %v412_v38 }
  0xbd   : > { %688 = vmatmul.mubr.bf16.gmra.mrb[8].mxu1 %v420_v39  ;;  %657 = vmatprep.mubr.bf16.mxu0 %v415_v40 }
  0xbe   : > { %697 = vmatprep.mubr.bf16.mxu1 %v423_v41 }
  0xc4   : > { %658 = vmatmul.mubr.bf16.gmra.mrb[12].mxu0 %v414_v46 }
  0xc5   : > { %698 = vmatmul.mubr.bf16.gmra.mrb[12].mxu1 %v422_v47 }
 0x17f   : > { %v629_v55 = vpop.f32.mrb[0].mxu0 }
 0x180   : > { %v669_v56 = vpop.f32.mrb[0].mxu1  ;;  %v2026_v57 = vadd.f32 %v629_v55, %v2021_v53  ;;  %v631_v59 = vpop.f32.mrb[1].mxu0 }
 0x181   : > { %v2029_v58 = vadd.f32 %v669_v56, %v2021_v53  ;;  %v671_v60 = vpop.f32.mrb[1].mxu1  ;;  %v2032_v61 = vadd.f32 %v631_v59, %v2023_v54  ;;  %v633_v63 = vpop.f32.mrb[2].mxu0 }
 0x182   : > { %v2035_v62 = vadd.f32 %v671_v60, %v2023_v54  ;;  %v673_v0 = vpop.f32.mrb[2].mxu1  ;;  %708 = vst [vmem:[#allocation2] sm:$0xff] %v2026_v57  ;;  %v2040_v1 = vadd.f32 %v633_v63, %v2021_v53  ;;  %v635_v3 = vpop.f32.mrb[3].mxu0 }
 0x183   : > { %724 = vst [vmem:[#allocation2 + $0x80] sm:$0xff] %v2029_v58  ;;  %v2043_v2 = vadd.f32 %v673_v0, %v2021_v53  ;;  %v675_v4 = vpop.f32.mrb[3].mxu1  ;;  %709 = vst [vmem:[#allocation2 + $0x8] sm:$0xff] %v2032_v61  ;;  %v2048_v5 = vadd.f32 %v635_v3, %v2023_v54 }
 0x184   : > { %725 = vst [vmem:[#allocation2 + $0x88] sm:$0xff] %v2035_v62  ;;  %v2051_v6 = vadd.f32 %v675_v4, %v2023_v54  ;;  %710 = vst [vmem:[#allocation2 + $0x10] sm:$0xff] %v2040_v1 }
 0x185   : > { %726 = vst [vmem:[#allocation2 + $0x90] sm:$0xff] %v2043_v2  ;;  %711 = vst [vmem:[#allocation2 + $0x18] sm:$0xff] %v2048_v5 }
 0x186   : > { %727 = vst [vmem:[#allocation2 + $0x98] sm:$0xff] %v2051_v6 }
 0x187   : > { %v639_v7 = vpop.f32.mrb[4].mxu0 }
 0x188   : > { %v679_v8 = vpop.f32.mrb[4].mxu1  ;;  %v2058_v9 = vadd.f32 %v639_v7, %v2021_v53  ;;  %v641_v11 = vpop.f32.mrb[5].mxu0 }
 0x189   : > { %v2061_v10 = vadd.f32 %v679_v8, %v2021_v53  ;;  %v681_v12 = vpop.f32.mrb[5].mxu1  ;;  %v2064_v13 = vadd.f32 %v641_v11, %v2023_v54  ;;  %v643_v15 = vpop.f32.mrb[6].mxu0 }
 0x18a   : > { %v2067_v14 = vadd.f32 %v681_v12, %v2023_v54  ;;  %v683_v16 = vpop.f32.mrb[6].mxu1  ;;  %712 = vst [vmem:[#allocation2 + $0x20] sm:$0xff] %v2058_v9  ;;  %v2072_v17 = vadd.f32 %v643_v15, %v2021_v53  ;;  %v645_v19 = vpop.f32.mrb[7].mxu0 }
 0x18b   : > { %728 = vst [vmem:[#allocation2 + $0xa0] sm:$0xff] %v2061_v10  ;;  %v2075_v18 = vadd.f32 %v683_v16, %v2021_v53  ;;  %v685_v20 = vpop.f32.mrb[7].mxu1  ;;  %713 = vst [vmem:[#allocation2 + $0x28] sm:$0xff] %v2064_v13  ;;  %v2080_v21 = vadd.f32 %v645_v19, %v2023_v54 }
 0x18c   : > { %729 = vst [vmem:[#allocation2 + $0xa8] sm:$0xff] %v2067_v14  ;;  %v2083_v22 = vadd.f32 %v685_v20, %v2023_v54  ;;  %714 = vst [vmem:[#allocation2 + $0x30] sm:$0xff] %v2072_v17 }
 0x18d   : > { %730 = vst [vmem:[#allocation2 + $0xb0] sm:$0xff] %v2075_v18  ;;  %715 = vst [vmem:[#allocation2 + $0x38] sm:$0xff] %v2080_v21 }
 0x18e   : > { %731 = vst [vmem:[#allocation2 + $0xb8] sm:$0xff] %v2083_v22 }
 0x18f   : > { %v649_v23 = vpop.f32.mrb[8].mxu0 }
 0x190   : > { %v689_v24 = vpop.f32.mrb[8].mxu1  ;;  %v2090_v25 = vadd.f32 %v649_v23, %v2021_v53  ;;  %v651_v27 = vpop.f32.mrb[9].mxu0 }
 0x191   : > { %v2093_v26 = vadd.f32 %v689_v24, %v2021_v53  ;;  %v691_v28 = vpop.f32.mrb[9].mxu1  ;;  %v2096_v29 = vadd.f32 %v651_v27, %v2023_v54  ;;  %v653_v31 = vpop.f32.mrb[10].mxu0 }
 0x192   : > { %v2099_v30 = vadd.f32 %v691_v28, %v2023_v54  ;;  %v693_v32 = vpop.f32.mrb[10].mxu1  ;;  %716 = vst [vmem:[#allocation2 + $0x40] sm:$0xff] %v2090_v25  ;;  %v2104_v33 = vadd.f32 %v653_v31, %v2021_v53  ;;  %v655_v35 = vpop.f32.mrb[11].mxu0 }
 0x193   : > { %732 = vst [vmem:[#allocation2 + $0xc0] sm:$0xff] %v2093_v26  ;;  %v2107_v34 = vadd.f32 %v693_v32, %v2021_v53  ;;  %v695_v36 = vpop.f32.mrb[11].mxu1  ;;  %717 = vst [vmem:[#allocation2 + $0x48] sm:$0xff] %v2096_v29  ;;  %v2112_v37 = vadd.f32 %v655_v35, %v2023_v54 }
 0x194   : > { %733 = vst [vmem:[#allocation2 + $0xc8] sm:$0xff] %v2099_v30  ;;  %v2115_v38 = vadd.f32 %v695_v36, %v2023_v54  ;;  %718 = vst [vmem:[#allocation2 + $0x50] sm:$0xff] %v2104_v33 }
 0x195   : > { %734 = vst [vmem:[#allocation2 + $0xd0] sm:$0xff] %v2107_v34  ;;  %719 = vst [vmem:[#allocation2 + $0x58] sm:$0xff] %v2112_v37 }
 0x196   : > { %735 = vst [vmem:[#allocation2 + $0xd8] sm:$0xff] %v2115_v38 }
 0x197   : > { %v659_v39 = vpop.f32.mrb[12].mxu0 }
 0x198   : > { %v699_v40 = vpop.f32.mrb[12].mxu1  ;;  %v2122_v41 = vadd.f32 %v659_v39, %v2021_v53  ;;  %v661_v43 = vpop.f32.mrb[13].mxu0  ;;  %743 = sbr.rel (%p1353_p5) target bundleno = 809 (0x329), region = 52 }
 0x199   : > { %v2125_v42 = vadd.f32 %v699_v40, %v2021_v53  ;;  %v701_v44 = vpop.f32.mrb[13].mxu1  ;;  %v2128_v45 = vadd.f32 %v661_v43, %v2023_v54  ;;  %v663_v47 = vpop.f32.mrb[14].mxu0 }
 0x19a   : > { %v2131_v46 = vadd.f32 %v701_v44, %v2023_v54  ;;  %v703_v49 = vpop.f32.mrb[14].mxu1  ;;  %720 = vst [vmem:[#allocation2 + $0x60] sm:$0xff] %v2122_v41  ;;  %v2136_v50 = vadd.f32 %v663_v47, %v2021_v53  ;;  %v665_v52 = vpop.f32.mrb[15].mxu0 }
 0x19b   : > { %736 = vst [vmem:[#allocation2 + $0xe0] sm:$0xff] %v2125_v42  ;;  %v2139_v51 = vadd.f32 %v703_v49, %v2021_v53  ;;  %v705_v55 = vpop.f32.mrb[15].mxu1  ;;  %721 = vst [vmem:[#allocation2 + $0x68] sm:$0xff] %v2128_v45  ;;  %v2144_v56 = vadd.f32 %v665_v52, %v2023_v54 }
 0x19c   : > { %737 = vst [vmem:[#allocation2 + $0xe8] sm:$0xff] %v2131_v46  ;;  %v2147_v59 = vadd.f32 %v705_v55, %v2023_v54  ;;  %722 = vst [vmem:[#allocation2 + $0x70] sm:$0xff] %v2136_v50 }
 0x19d   : > { %738 = vst [vmem:[#allocation2 + $0xf0] sm:$0xff] %v2139_v51  ;;  %723 = vst [vmem:[#allocation2 + $0x78] sm:$0xff] %v2144_v56 }
 0x19e   : > { %739 = vst [vmem:[#allocation2 + $0xf8] sm:$0xff] %v2147_v59 }
 0x19f   : > { %v750_v53 = vmax.f32 %v2058_v9, %v2064_v13  ;;  %v744_v60 = vmax.f32 %v2026_v57, %v2032_v61  ;;  %v753_v54 = vmax.f32 %v2072_v17, %v2080_v21  ;;  %v747_v63 = vmax.f32 %v2040_v1, %v2048_v5  ;;  %v984_v27 = vld [vmem:[%s1941_s14] sm:$0xff]  ;;  %v986_v28 = vld [vmem:[%s1941_s14 + $0x10] sm:$0xff]  ;;  %v985_v31 = vld [vmem:[%s1941_s14 + $0x8] sm:$0xff] }
 0x1a0   : > { %v1760_v0 = vmov 0   ;;  %v759_v3 = vmax.f32 %v2104_v33, %v2112_v37  ;;  %v756_v4 = vmax.f32 %v2090_v25, %v2096_v29  ;;  %v765_v7 = vmax.f32 %v2136_v50, %v2144_v56  ;;  %v987_v32 = vld [vmem:[%s1941_s14 + $0x18] sm:$0xff]  ;;  %v994_v35 = vld [vmem:[%s1941_s14 + $0x50] sm:$0xff]  ;;  %v988_v36 = vld [vmem:[%s1941_s14 + $0x20] sm:$0xff] }
 0x1a1   : > { %751 = vmax.xlane.f32.xlu1 %v750_v53  ;;  %745 = vmax.xlane.f32.xlu0 %v744_v60  ;;  %v762_v8 = vmax.f32 %v2122_v41, %v2128_v45  ;;  %v771_v11 = vmax.f32 %v2043_v2, %v2051_v6  ;;  %v768_v12 = vmax.f32 %v2029_v58, %v2035_v62  ;;  %v996_v39 = vld [vmem:[%s1941_s14 + $0x60] sm:$0xff]  ;;  %v989_v40 = vld [vmem:[%s1941_s14 + $0x28] sm:$0xff]  ;;  %v998_v43 = vld [vmem:[%s1941_s14 + $0x70] sm:$0xff] }
 0x1a2   : > { %1526 = vset.pattern.permute.xlu1 %v1760_v0  ;;  %1527 = vset.pattern.permute.xlu0 %v1760_v0  ;;  %v777_v15 = vmax.f32 %v2075_v18, %v2083_v22  ;;  %v774_v16 = vmax.f32 %v2061_v10, %v2067_v14  ;;  %v783_v19 = vmax.f32 %v2107_v34, %v2115_v38  ;;  %v990_v44 = vld [vmem:[%s1941_s14 + $0x30] sm:$0xff]  ;;  %v991_v47 = vld [vmem:[%s1941_s14 + $0x38] sm:$0xff]  ;;  %v992_v49 = vld [vmem:[%s1941_s14 + $0x40] sm:$0xff] }
 0x1a3   : > { %v780_v20 = vmax.f32 %v2093_v26, %v2099_v30  ;;  %v789_v23 = vmax.f32 %v2139_v51, %v2147_v59  ;;  %v786_v24 = vmax.f32 %v2125_v42, %v2131_v46  ;;  %v993_v52 = vld [vmem:[%s1941_s14 + $0x48] sm:$0xff]  ;;  %v995_v55 = vld [vmem:[%s1941_s14 + $0x58] sm:$0xff] }
 0x1a4   : > { %v997_v53 = vld [vmem:[%s1941_s14 + $0x68] sm:$0xff]  ;;  %v999_v60 = vld [vmem:[%s1941_s14 + $0x78] sm:$0xff] }
 0x1a5   : > { %754 = vmax.xlane.f32.xlu1 %v753_v54  ;;  %748 = vmax.xlane.f32.xlu0 %v747_v63 }
 0x1a9   : > { %760 = vmax.xlane.f32.xlu1 %v759_v3  ;;  %757 = vmax.xlane.f32.xlu0 %v756_v4 }
 0x1ad   : > { %766 = vmax.xlane.f32.xlu1 %v765_v7  ;;  %763 = vmax.xlane.f32.xlu0 %v762_v8 }
 0x1b1   : > { %772 = vmax.xlane.f32.xlu1 %v771_v11  ;;  %769 = vmax.xlane.f32.xlu0 %v768_v12 }
 0x1b5   : > { %778 = vmax.xlane.f32.xlu1 %v777_v15  ;;  %775 = vmax.xlane.f32.xlu0 %v774_v16 }
 0x1b9   : > { %784 = vmax.xlane.f32.xlu1 %v783_v19  ;;  %781 = vmax.xlane.f32.xlu0 %v780_v20 }
 0x1bd   : > { %790 = vmax.xlane.f32.xlu1 %v789_v23  ;;  %787 = vmax.xlane.f32.xlu0 %v786_v24 }
 0x1ce   : > { %1004 = vperm.xlu1 %1526, %v984_v27  }
 0x1d2   : > { %1010 = vperm.xlu1 %1526, %v986_v28  }
 0x1d3   : > { %1007 = vperm.xlu0 %1527, %v985_v31   ;;  %v2237_v31 = vand.u32 127, %v425_v48 }
 0x1d6   : > { %1013 = vperm.xlu1 %1526, %v987_v32  }
 0x1d7   : > { %1034 = vperm.xlu0 %1527, %v994_v35  }
 0x1da   : > { %1016 = vperm.xlu1 %1526, %v988_v36  }
 0x1db   : > { %1040 = vperm.xlu0 %1527, %v996_v39  }
 0x1de   : > { %1019 = vperm.xlu1 %1526, %v989_v40  }
 0x1df   : > { %1046 = vperm.xlu0 %1527, %v998_v43  }
 0x1e2   : > { %1022 = vperm.xlu1 %1526, %v990_v44  }
 0x1e6   : > { %1025 = vperm.xlu1 %1526, %v991_v47   ;;  %v2248_v47 = vadd.s32 128, %v2237_v31 }
 0x1ea   : > { %1028 = vperm.xlu1 %1526, %v992_v49  }
 0x1ee   : > { %1031 = vperm.xlu1 %1526, %v993_v52  }
 0x1f2   : > { %1037 = vperm.xlu1 %1526, %v995_v55  }
 0x1f6   : > { %1043 = vperm.xlu1 %1526, %v997_v53  }
 0x1fa   : > { %1049 = vperm.xlu1 %1526, %v999_v60  }
 0x22e   : > { %v2202_v54 = vpop.xlane.xlu1 %751  ;;  %v2204_v63 = vpop.xlane.xlu0 %745 }
 0x22f   : > { %v796_v20 = vsub.f32 %v2058_v9, %v2202_v54  ;;  %v797_v23 = vsub.f32 %v2064_v13, %v2202_v54  ;;  %v792_v28 = vsub.f32 %v2026_v57, %v2204_v63  ;;  %v793_v32 = vsub.f32 %v2032_v61, %v2204_v63 }
 0x231   : > { %v832_v35 = vmul.f32 1.442695, %v796_v20  ;;  %v834_v39 = vmul.f32 1.442695, %v797_v23  ;;  %v824_v44 = vmul.f32 1.442695, %v792_v28 }
 0x232   : > { %v2206_v0 = vpop.xlane.xlu1 %754  ;;  %v2208_v3 = vpop.xlane.xlu0 %748  ;;  %v826_v49 = vmul.f32 1.442695, %v793_v32 }
 0x233   : > { %2478 = vst [vmem:[#allocation9_spill] sm:$0xff] %v2206_v0  ;;  %v798_v36 = vsub.f32 %v2072_v17, %v2206_v0  ;;  %v799_v40 = vsub.f32 %v2080_v21, %v2206_v0  ;;  %v794_v48 = vsub.f32 %v2040_v1, %v2208_v3  ;;  %1528 = vpow2.f32 %v832_v35 }
 0x234   : > { %v795_v53 = vsub.f32 %v2048_v5, %v2208_v3  ;;  %1530 = vpow2.f32 %v834_v39 }
 0x235   : > { %v836_v55 = vmul.f32 1.442695, %v798_v36  ;;  %v838_v60 = vmul.f32 1.442695, %v799_v40  ;;  %1532 = vpow2.f32 %v824_v44  ;;  %v828_v23 = vmul.f32 1.442695, %v794_v48 }
 0x236   : > { %v2210_v4 = vpop.xlane.xlu1 %760  ;;  %v2212_v7 = vpop.xlane.xlu0 %757  ;;  %1534 = vpow2.f32 %v826_v49  ;;  %v830_v36 = vmul.f32 1.442695, %v795_v53 }
 0x237   : > { %2479 = vst [vmem:[#allocation10_spill] sm:$0xff] %v2210_v4  ;;  %1536 = vpow2.f32 %v836_v55  ;;  %v802_v35 = vsub.f32 %v2104_v33, %v2210_v4  ;;  %v803_v39 = vsub.f32 %v2112_v37, %v2210_v4  ;;  %v800_v40 = vsub.f32 %v2090_v25, %v2212_v7 }
 0x238   : > { %1538 = vpow2.f32 %v838_v60  ;;  %v801_v44 = vsub.f32 %v2096_v29, %v2212_v7 }
 0x239   : > { %v844_v60 = vmul.f32 1.442695, %v802_v35  ;;  %1540 = vpow2.f32 %v828_v23 }
 0x23a   : > { %v2214_v8 = vpop.xlane.xlu1 %766  ;;  %v2216_v11 = vpop.xlane.xlu0 %763  ;;  %1542 = vpow2.f32 %v830_v36 }
 0x23b   : > { %1544 = vpow2.f32 %v844_v60 }
 0x23d   : > { %v2280_v4 = vpop.eup %1528 }
 0x23e   : > { %v2218_v12 = vpop.xlane.xlu1 %772  ;;  %v2220_v15 = vpop.xlane.xlu0 %769 }
 0x23f   : > { %v809_v60 = vsub.f32 %v2035_v62, %v2220_v15 }
 0x242   : > { %v2222_v16 = vpop.xlane.xlu1 %778  ;;  %v2224_v19 = vpop.xlane.xlu0 %775 }
 0x246   : > { %v2230_v24 = vpop.xlane.xlu1 %784  ;;  %v2232_v27 = vpop.xlane.xlu0 %781 }
 0x24a   : > { %v2245_v43 = vpop.xlane.xlu1 %790  ;;  %v2252_v52 = vpop.xlane.xlu0 %787 }
 0x24e   : > { %v1005_v20 = vpop.permute.xlu1 %1004 }
 0x24f   : > { %vm1051_vm0 = vcmp.eq.s32.totalorder %v2237_v31, %v1005_v20  ;;  %vm1052_vm1 = vcmp.eq.s32.totalorder %v2248_v47, %v1005_v20  ;;  %v806_v20 = vsub.f32 %v2136_v50, %v2214_v8 }
 0x250   : > { %v1083_v28 = vsel %vm1051_vm0, %v2026_v57, 0.0  ;;  %v1084_v32 = vsel %vm1052_vm1, %v2032_v61, 0.0 }
 0x251   : > { %v1115_v0 = vadd.f32 %v1084_v32, %v1083_v28 }
 0x252   : > { %v1011_v49 = vpop.permute.xlu1 %1010  ;;  %v1008_v57 = vpop.permute.xlu0 %1007 }
 0x253   : > { %vm1055_vm2 = vcmp.eq.s32.totalorder %v2237_v31, %v1011_v49  ;;  %vm1056_vm3 = vcmp.eq.s32.totalorder %v2248_v47, %v1011_v49  ;;  %vm1053_vm4 = vcmp.eq.s32.totalorder %v2237_v31, %v1008_v57  ;;  %vm1054_vm5 = vcmp.eq.s32.totalorder %v2248_v47, %v1008_v57  ;;  %1116 = vadd.xlane.f32.xlu0 %v1115_v0 }
 0x254   : > { %v1087_v61 = vsel %vm1055_vm2, %v2058_v9, 0.0  ;;  %v1088_v48 = vsel %vm1056_vm3, %v2064_v13, 0.0  ;;  %v1085_v55 = vsel %vm1053_vm4, %v2040_v1, 0.0  ;;  %v1086_v53 = vsel %vm1054_vm5, %v2048_v5, 0.0  ;;  %v2286_v5 = vpop.eup %1530 }
 0x255   : > { %v1121_v28 = vadd.f32 %v1088_v48, %v1087_v61  ;;  %v1118_v32 = vadd.f32 %v1086_v53, %v1085_v55  ;;  %v846_v49 = vmul.f32 1.442695, %v803_v39  ;;  %v804_v57 = vsub.f32 %v2122_v41, %v2216_v11  ;;  %v1533_v39 = vpop.eup %1532 }
 0x256   : > { %v1014_v0 = vpop.permute.xlu1 %1013  ;;  %v840_v9 = vmul.f32 1.442695, %v800_v40  ;;  %v805_v1 = vsub.f32 %v2128_v45, %v2216_v11  ;;  %v842_v13 = vmul.f32 1.442695, %v801_v44  ;;  %v852_v40 = vmul.f32 1.442695, %v806_v20  ;;  %v1535_v48 = vpop.eup %1534 }
 0x257   : > { %vm1057_vm6 = vcmp.eq.s32.totalorder %v2237_v31, %v1014_v0  ;;  %vm1058_vm7 = vcmp.eq.s32.totalorder %v2248_v47, %v1014_v0  ;;  %1122 = vadd.xlane.f32.xlu0 %v1121_v28  ;;  %1119 = vadd.xlane.f32.xlu1 %v1118_v32  ;;  %1546 = vpow2.f32 %v846_v49  ;;  %v807_v55 = vsub.f32 %v2144_v56, %v2214_v8  ;;  %v2294_v44 = vpop.eup %1536 }
 0x258   : > { %v1089_v23 = vsel %vm1057_vm6, %v2072_v17, 0.0  ;;  %v1090_v35 = vsel %vm1058_vm7, %v2080_v21, 0.0  ;;  %v848_v53 = vmul.f32 1.442695, %v804_v57  ;;  %v808_v28 = vsub.f32 %v2029_v58, %v2220_v15  ;;  %v2298_v21 = vpop.eup %1538 }
 0x259   : > { %v1124_v61 = vadd.f32 %v1090_v35, %v1089_v23  ;;  %1548 = vpow2.f32 %v840_v9  ;;  %v850_v17 = vmul.f32 1.442695, %v805_v1  ;;  %v810_v49 = vsub.f32 %v2043_v2, %v2218_v12 }
 0x25a   : > { %v1017_v36 = vpop.permute.xlu1 %1016  ;;  %1550 = vpow2.f32 %v842_v13  ;;  %v854_v0 = vmul.f32 1.442695, %v807_v55  ;;  %v811_v9 = vsub.f32 %v2051_v6, %v2218_v12  ;;  %v856_v1 = vmul.f32 1.442695, %v808_v28 }
 0x25b   : > { %vm1059_vm8 = vcmp.eq.s32.totalorder %v2237_v31, %v1017_v36  ;;  %vm1060_vm9 = vcmp.eq.s32.totalorder %v2248_v47, %v1017_v36  ;;  %1125 = vadd.xlane.f32.xlu1 %v1124_v61  ;;  %1552 = vpow2.f32 %v852_v40  ;;  %v812_v23 = vsub.f32 %v2061_v10, %v2224_v19 }
 0x25c   : > { %v1091_v20 = vsel %vm1059_vm8, %v2090_v25, 0.0  ;;  %v1092_v32 = vsel %vm1060_vm9, %v2096_v29, 0.0  ;;  %1554 = vpow2.f32 %v848_v53  ;;  %v1541_v25 = vpop.eup %1540  ;;  %v858_v29 = vmul.f32 1.442695, %v809_v60 }
 0x25d   : > { %v1127_v57 = vadd.f32 %v1092_v32, %v1091_v20  ;;  %1556 = vpow2.f32 %v850_v17  ;;  %v813_v35 = vsub.f32 %v2067_v14, %v2224_v19  ;;  %v860_v55 = vmul.f32 1.442695, %v810_v49  ;;  %v1543_v17 = vpop.eup %1542 }
 0x25e   : > { %v1020_v13 = vpop.permute.xlu1 %1019  ;;  %v814_v53 = vsub.f32 %v2075_v18, %v2222_v16  ;;  %v888_v28 = vadd.f32 %v1535_v48, %v1533_v39  ;;  %1558 = vpow2.f32 %v854_v0  ;;  %v862_v20 = vmul.f32 1.442695, %v811_v9  ;;  %v1545_v60 = vpop.eup %1544 }
 0x25f   : > { %vm1061_vm10 = vcmp.eq.s32.totalorder %v2237_v31, %v1020_v13  ;;  %vm1062_vm11 = vcmp.eq.s32.totalorder %v2248_v47, %v1020_v13  ;;  %1128 = vadd.xlane.f32.xlu0 %v1127_v57  ;;  %v815_v32 = vsub.f32 %v2083_v22, %v2222_v16  ;;  %1560 = vpow2.f32 %v856_v1 }
 0x260   : > { %v1093_v40 = vsel %vm1061_vm10, %v2104_v33, 0.0  ;;  %v1094_v61 = vsel %vm1062_vm11, %v2112_v37, 0.0  ;;  %v818_v57 = vsub.f32 %v2107_v34, %v2230_v24  ;;  %v864_v33 = vmul.f32 1.442695, %v812_v23 }
 0x261   : > { %v1130_v36 = vadd.f32 %v1094_v61, %v1093_v40  ;;  %v1547_v37 = vpop.eup %1546  ;;  %1562 = vpow2.f32 %v858_v29  ;;  %v819_v39 = vsub.f32 %v2115_v38, %v2230_v24  ;;  %v866_v48 = vmul.f32 1.442695, %v813_v35 }
 0x262   : > { %v2324_v49 = vpop.permute.xlu1 %1022  ;;  %v894_v0 = vadd.f32 %v2286_v5, %v2280_v4  ;;  %1564 = vpow2.f32 %v860_v55  ;;  %v868_v1 = vmul.f32 1.442695, %v814_v53  ;;  %v816_v13 = vsub.f32 %v2093_v26, %v2232_v27 }
 0x263   : > { %889 = vadd.xlane.f32.xlu0 %v888_v28  ;;  %1131 = vadd.xlane.f32.xlu1 %v1130_v36  ;;  %v1549_v9 = vpop.eup %1548  ;;  %v891_v23 = vadd.f32 %v1543_v17, %v1541_v25  ;;  %1566 = vpow2.f32 %v862_v20  ;;  %v870_v61 = vmul.f32 1.442695, %v815_v32  ;;  %v817_v29 = vsub.f32 %v2099_v30, %v2232_v27 }
 0x264   : > { %v1551_v40 = vpop.eup %1550  ;;  %v876_v35 = vmul.f32 1.442695, %v818_v57  ;;  %1568 = vpow2.f32 %v864_v33  ;;  %v822_v36 = vsub.f32 %v2139_v51, %v2245_v43  ;;  %v878_v5 = vmul.f32 1.442695, %v819_v39 }
 0x265   : > { %v1553_v28 = vpop.eup %1552  ;;  %1570 = vpow2.f32 %v866_v48  ;;  %v823_v25 = vsub.f32 %v2147_v59, %v2245_v43  ;;  %v872_v53 = vmul.f32 1.442695, %v816_v13  ;;  %v900_v17 = vadd.f32 %v1551_v40, %v1549_v9 }
 0x266   : > { %v1555_v4 = vpop.eup %1554  ;;  %1572 = vpow2.f32 %v868_v1  ;;  %v897_v20 = vadd.f32 %v2298_v21, %v2294_v44  ;;  %v874_v32 = vmul.f32 1.442695, %v817_v29  ;;  %v1026_v57 = vpop.permute.xlu1 %1025  ;;  %v884_v33 = vmul.f32 1.442695, %v822_v36 }
 0x267   : > { %895 = vadd.xlane.f32.xlu0 %v894_v0  ;;  %892 = vadd.xlane.f32.xlu1 %v891_v23  ;;  %v1557_v55 = vpop.eup %1556  ;;  %1574 = vpow2.f32 %v870_v61  ;;  %v820_v0 = vsub.f32 %v2125_v42, %v2252_v52  ;;  %v886_v48 = vmul.f32 1.442695, %v823_v25  ;;  %v821_v1 = vsub.f32 %v2131_v46, %v2252_v52 }
 0x268   : > { %1576 = vpow2.f32 %v876_v35  ;;  %v1559_v39 = vpop.eup %1558  ;;  %v906_v13 = vadd.f32 %v1557_v55, %v1555_v4  ;;  %v903_v44 = vadd.f32 %v1547_v37, %v1545_v60  ;;  %vm1065_vm12 = vcmp.eq.s32.totalorder %v2237_v31, %v1026_v57 }
 0x269   : > { %1578 = vpow2.f32 %v878_v5  ;;  %v1561_v9 = vpop.eup %1560  ;;  %v880_v40 = vmul.f32 1.442695, %v820_v0  ;;  %v882_v29 = vmul.f32 1.442695, %v821_v1  ;;  %v909_v25 = vadd.f32 %v1559_v39, %v1553_v28 }
 0x26a   : > { %1580 = vpow2.f32 %v872_v53  ;;  %v1029_v35 = vpop.permute.xlu1 %1028  ;;  %vm1066_vm13 = vcmp.eq.s32.totalorder %v2248_v47, %v1026_v57  ;;  %vm1063_vm14 = vcmp.eq.s32.totalorder %v2237_v31, %v2324_v49  ;;  %vm1064_vm15 = vcmp.eq.s32.totalorder %v2248_v47, %v2324_v49  ;;  %v1035_v57 = vpop.permute.xlu0 %1034 }
 0x26b   : > { %901 = vadd.xlane.f32.xlu0 %v900_v17  ;;  %898 = vadd.xlane.f32.xlu1 %v897_v20  ;;  %v1563_v21 = vpop.eup %1562  ;;  %1582 = vpow2.f32 %v874_v32  ;;  %vm1067_vm2 = vcmp.eq.s32.totalorder %v2237_v31, %v1029_v35  ;;  %vm1068_vm3 = vcmp.eq.s32.totalorder %v2248_v47, %v1029_v35  ;;  %vm1071_vm6 = vcmp.eq.s32.totalorder %v2237_v31, %v1035_v57 }
 0x26c   : > { %v1565_v23 = vpop.eup %1564  ;;  %1584 = vpow2.f32 %v884_v33  ;;  %v912_v5 = vadd.f32 %v1563_v21, %v1561_v9  ;;  %vm1072_vm7 = vcmp.eq.s32.totalorder %v2248_v47, %v1035_v57 }
 0x26d   : > { %v1567_v61 = vpop.eup %1566  ;;  %1586 = vpow2.f32 %v886_v48 }
 0x26e   : > { %v1569_v36 = vpop.eup %1568  ;;  %1588 = vpow2.f32 %v880_v40  ;;  %v915_v4 = vadd.f32 %v1567_v61, %v1565_v23  ;;  %v1032_v32 = vpop.permute.xlu1 %1031  ;;  %v1097_v40 = vsel %vm1065_vm12, %v2136_v50, 0.0  ;;  %v1098_v61 = vsel %vm1066_vm13, %v2144_v56, 0.0 }
 0x26f   : > { %907 = vadd.xlane.f32.xlu0 %v906_v13  ;;  %904 = vadd.xlane.f32.xlu1 %v903_v44  ;;  %v1571_v17 = vpop.eup %1570  ;;  %1590 = vpow2.f32 %v882_v29  ;;  %vm1069_vm0 = vcmp.eq.s32.totalorder %v2237_v31, %v1032_v32  ;;  %vm1070_vm1 = vcmp.eq.s32.totalorder %v2248_v47, %v1032_v32  ;;  %v1095_v29 = vsel %vm1063_vm14, %v2122_v41, 0.0 }
 0x270   : > { %v1573_v20 = vpop.eup %1572  ;;  %v918_v55 = vadd.f32 %v1571_v17, %v1569_v36  ;;  %v1101_v50 = vsel %vm1069_vm0, %v2043_v2, 0.0  ;;  %v1102_v56 = vsel %vm1070_vm1, %v2051_v6, 0.0  ;;  %v1100_v2 = vsel %vm1068_vm3, %v2035_v62, 0.0 }
 0x271   : > { %v1575_v60 = vpop.eup %1574  ;;  %v1142_v17 = vadd.f32 %v1102_v56, %v1101_v50  ;;  %vm1179_vm0 = vcmask 7168  }
 0x272   : > { %v1577_v37 = vpop.eup %1576  ;;  %v921_v1 = vadd.f32 %v1575_v60, %v1573_v20  ;;  %v1038_v39 = vpop.permute.xlu1 %1037  ;;  %v1099_v20 = vsel %vm1067_vm2, %v2029_v58, 0.0  ;;  %v1104_v58 = vsel %vm1072_vm7, %v2067_v14, 0.0 }
 0x273   : > { %913 = vadd.xlane.f32.xlu0 %v912_v5  ;;  %910 = vadd.xlane.f32.xlu1 %v909_v25  ;;  %v1579_v53 = vpop.eup %1578  ;;  %v1136_v5 = vadd.f32 %v1098_v61, %v1097_v40  ;;  %v1096_v25 = vsel %vm1064_vm15, %v2128_v45, 0.0  ;;  %vm1073_vm4 = vcmp.eq.s32.totalorder %v2237_v31, %v1038_v39  ;;  %vm1074_vm5 = vcmp.eq.s32.totalorder %v2248_v47, %v1038_v39  ;;  %v1041_v45 = vpop.permute.xlu0 %1040 }
 0x274   : > { %v1581_v33 = vpop.eup %1580  ;;  %v927_v9 = vadd.f32 %v1579_v53, %v1577_v37  ;;  %v1133_v41 = vadd.f32 %v1096_v25, %v1095_v29  ;;  %v1105_v6 = vsel %vm1073_vm4, %v2075_v18, 0.0  ;;  %v1106_v60 = vsel %vm1074_vm5, %v2083_v22, 0.0 }
 0x275   : > { %v1583_v0 = vpop.eup %1582  ;;  %v1103_v37 = vsel %vm1071_vm6, %v2061_v10, 0.0  ;;  %vm1075_vm10 = vcmp.eq.s32.totalorder %v2237_v31, %v1041_v45  ;;  %vm1076_vm11 = vcmp.eq.s32.totalorder %v2248_v47, %v1041_v45 }
 0x276   : > { %v1585_v48 = vpop.eup %1584  ;;  %v924_v44 = vadd.f32 %v1583_v0, %v1581_v33  ;;  %v1044_v49 = vpop.permute.xlu1 %1043  ;;  %v1145_v53 = vadd.f32 %v1104_v58, %v1103_v37  ;;  %v1107_v32 = vsel %vm1075_vm10, %v2093_v26, 0.0  ;;  %v1108_v14 = vsel %vm1076_vm11, %v2099_v30, 0.0  ;;  %v2480_v37 = vld [vmem:[#allocation9_spill] sm:$0xff] }
 0x277   : > { %916 = vadd.xlane.f32.xlu0 %v915_v4  ;;  %919 = vadd.xlane.f32.xlu1 %v918_v55  ;;  %v1587_v28 = vpop.eup %1586  ;;  %vm1077_vm8 = vcmp.eq.s32.totalorder %v2237_v31, %v1044_v49  ;;  %vm1078_vm9 = vcmp.eq.s32.totalorder %v2248_v47, %v1044_v49  ;;  %v1139_v4 = vadd.f32 %v1100_v2, %v1099_v20  ;;  %v1047_v22 = vpop.permute.xlu0 %1046 }
 0x278   : > { %v1589_v13 = vpop.eup %1588  ;;  %v933_v21 = vadd.f32 %v1587_v28, %v1585_v48  ;;  %v1148_v55 = vadd.f32 %v1106_v60, %v1105_v6  ;;  %v1109_v62 = vsel %vm1077_vm8, %v2107_v34, 0.0  ;;  %v1110_v18 = vsel %vm1078_vm9, %v2115_v38, 0.0 }
 0x279   : > { %v1591_v23 = vpop.eup %1590  ;;  %v1154_v10 = vadd.f32 %v1110_v18, %v1109_v62  ;;  %vm1079_vm14 = vcmp.eq.s32.totalorder %v2237_v31, %v1047_v22  ;;  %vm1080_vm15 = vcmp.eq.s32.totalorder %v2248_v47, %v1047_v22  ;;  %v1151_v0 = vadd.f32 %v1108_v14, %v1107_v32 }
 0x27a   : > { %v930_v36 = vadd.f32 %v1591_v23, %v1589_v13  ;;  %v1050_v35 = vpop.permute.xlu1 %1049  ;;  %v1111_v48 = vsel %vm1079_vm14, %v2125_v42, 0.0 }
 0x27b   : > { %922 = vadd.xlane.f32.xlu0 %v921_v1  ;;  %928 = vadd.xlane.f32.xlu1 %v927_v9  ;;  %vm1081_vm12 = vcmp.eq.s32.totalorder %v2237_v31, %v1050_v35  ;;  %vm1082_vm13 = vcmp.eq.s32.totalorder %v2248_v47, %v1050_v35  ;;  %v1112_v1 = vsel %vm1080_vm15, %v2131_v46, 0.0 }
 0x27c   : > { %v1113_v33 = vsel %vm1081_vm12, %v2139_v51, 0.0  ;;  %v1114_v34 = vsel %vm1082_vm13, %v2147_v59, 0.0  ;;  %v1157_v26 = vadd.f32 %v1112_v1, %v1111_v48 }
 0x27d   : > { %v1160_v38 = vadd.f32 %v1114_v34, %v1113_v33 }
 0x27f   : > { %925 = vadd.xlane.f32.xlu0 %v924_v44  ;;  %934 = vadd.xlane.f32.xlu1 %v933_v21 }
 0x283   : > { %931 = vadd.xlane.f32.xlu0 %v930_v36  ;;  %1137 = vadd.xlane.f32.xlu1 %v1136_v5 }
 0x287   : > { %1134 = vadd.xlane.f32.xlu0 %v1133_v41  ;;  %1143 = vadd.xlane.f32.xlu1 %v1142_v17 }
 0x28b   : > { %1140 = vadd.xlane.f32.xlu0 %v1139_v4  ;;  %1149 = vadd.xlane.f32.xlu1 %v1148_v55 }
 0x28f   : > { %1155 = vadd.xlane.f32.xlu1 %v1154_v10  ;;  %1146 = vadd.xlane.f32.xlu0 %v1145_v53  ;;  %v2481_v10 = vld [vmem:[#allocation10_spill] sm:$0xff] }
 0x293   : > { %1161 = vadd.xlane.f32.xlu1 %v1160_v38  ;;  %1152 = vadd.xlane.f32.xlu0 %v1151_v0 }
 0x297   : > { %1158 = vadd.xlane.f32.xlu0 %v1157_v26 }
 0x2e0   : > { %v1117_v30 = vpop.xlane.xlu0 %1116 }
 0x2e4   : > { %v1120_v51 = vpop.xlane.xlu1 %1119  ;;  %v1123_v9 = vpop.xlane.xlu0 %1122 }
 0x2e8   : > { %v1126_v59 = vpop.xlane.xlu1 %1125 }
 0x2ec   : > { %v1129_v28 = vpop.xlane.xlu0 %1128 }
 0x2f0   : > { %v2384_v31 = vpop.xlane.xlu1 %1131  ;;  %v890_v47 = vpop.xlane.xlu0 %889 }
 0x2f1   : > { %1592 = vlog2.f32 %v890_v47 }
 0x2f4   : > { %v893_v39 = vpop.xlane.xlu1 %892  ;;  %v896_v13 = vpop.xlane.xlu0 %895 }
 0x2f5   : > { %1594 = vlog2.f32 %v893_v39 }
 0x2f6   : > { %1596 = vlog2.f32 %v896_v13 }
 0x2f8   : > { %v899_v42 = vpop.xlane.xlu1 %898  ;;  %v902_v44 = vpop.xlane.xlu0 %901 }
 0x2f9   : > { %1598 = vlog2.f32 %v899_v42 }
 0x2fa   : > { %1600 = vlog2.f32 %v902_v44 }
 0x2fb   : > { %v1593_v46 = vpop.eup %1592 }
 0x2fc   : > { %v937_v21 = vmul.f32 0.6931472, %v1593_v46  ;;  %v905_v23 = vpop.xlane.xlu1 %904  ;;  %v908_v40 = vpop.xlane.xlu0 %907 }
 0x2fd   : > { %1602 = vlog2.f32 %v905_v23 }
 0x2fe   : > { %v968_v61 = vadd.f32 %v937_v21, %v2204_v63 }
 0x2ff   : > { %v1595_v57 = vpop.eup %1594 }
 0x300   : > { %v1597_v29 = vpop.eup %1596  ;;  %v1163_v36 = vsub.f32 %v968_v61, %v1117_v30  ;;  %v939_v5 = vmul.f32 0.6931472, %v1595_v57  ;;  %v911_v25 = vpop.xlane.xlu1 %910 }
 0x301   : > { %v914_v50 = vpop.xlane.xlu0 %913  ;;  %v941_v56 = vmul.f32 0.6931472, %v1597_v29  ;;  %1604 = vlog2.f32 %v911_v25 }
 0x302   : > { %1180 = vst.msk [vmem:[%s1946_s25] sm:$0xff] %vm1179_vm0, %v1163_v36  ;;  %v969_v49 = vadd.f32 %v939_v5, %v2208_v3  ;;  %1606 = vlog2.f32 %v908_v40 }
 0x303   : > { %v1599_v41 = vpop.eup %1598  ;;  %v970_v17 = vadd.f32 %v941_v56, %v2202_v54  ;;  %1608 = vlog2.f32 %v914_v50 }
 0x304   : > { %v1601_v63 = vpop.eup %1600  ;;  %v1164_v45 = vsub.f32 %v969_v49, %v1120_v51  ;;  %v943_v20 = vmul.f32 0.6931472, %v1599_v41  ;;  %v920_v2 = vpop.xlane.xlu1 %919 }
 0x305   : > { %v917_v6 = vpop.xlane.xlu0 %916  ;;  %v1165_v60 = vsub.f32 %v970_v17, %v1123_v9  ;;  %v945_v35 = vmul.f32 0.6931472, %v1601_v63 }
 0x306   : > { %1181 = vst.msk [vmem:[%s1946_s25 + $0x8] sm:$0xff] %vm1179_vm0, %v1164_v45  ;;  %v971_v4 = vadd.f32 %v943_v20, %v2480_v37  ;;  %1610 = vlog2.f32 %v917_v6 }
 0x307   : > { %v1603_v3 = vpop.eup %1602  ;;  %1182 = vst.msk [vmem:[%s1946_s25 + $0x10] sm:$0xff] %vm1179_vm0, %v1165_v60  ;;  %v972_v54 = vadd.f32 %v945_v35, %v2212_v7  ;;  %1612 = vlog2.f32 %v920_v2 }
 0x308   : > { %v1166_v55 = vsub.f32 %v971_v4, %v1126_v59  ;;  %v947_v58 = vmul.f32 0.6931472, %v1603_v3  ;;  %v929_v62 = vpop.xlane.xlu1 %928 }
 0x309   : > { %v923_v18 = vpop.xlane.xlu0 %922  ;;  %v1167_v22 = vsub.f32 %v972_v54, %v1129_v28  ;;  %1614 = vlog2.f32 %v929_v62 }
 0x30a   : > { %1183 = vst.msk [vmem:[%s1946_s25 + $0x18] sm:$0xff] %vm1179_vm0, %v1166_v55  ;;  %v973_v53 = vadd.f32 %v947_v58, %v2481_v10  ;;  %1616 = vlog2.f32 %v923_v18 }
 0x30b   : > { %v1605_v32 = vpop.eup %1604  ;;  %1184 = vst.msk [vmem:[%s1946_s25 + $0x20] sm:$0xff] %vm1179_vm0, %v1167_v22 }
 0x30c   : > { %v1607_v14 = vpop.eup %1606  ;;  %v1168_v33 = vsub.f32 %v973_v53, %v2384_v31  ;;  %v951_v7 = vmul.f32 0.6931472, %v1605_v32  ;;  %v935_v34 = vpop.xlane.xlu1 %934 }
 0x30d   : > { %v926_v38 = vpop.xlane.xlu0 %925  ;;  %1618 = vlog2.f32 %v935_v34  ;;  %v1609_v48 = vpop.eup %1608  ;;  %v949_v1 = vmul.f32 0.6931472, %v1607_v14 }
 0x30e   : > { %1185 = vst.msk [vmem:[%s1946_s25 + $0x28] sm:$0xff] %vm1179_vm0, %v1168_v33  ;;  %1620 = vlog2.f32 %v926_v38  ;;  %v975_v0 = vadd.f32 %v951_v7, %v2214_v8  ;;  %v953_v47 = vmul.f32 0.6931472, %v1609_v48 }
 0x30f   : > { %v974_v13 = vadd.f32 %v949_v1, %v2216_v11 }
 0x310   : > { %v1611_v26 = vpop.eup %1610  ;;  %v1138_v30 = vpop.xlane.xlu1 %1137 }
 0x311   : > { %v932_v51 = vpop.xlane.xlu0 %931  ;;  %v955_v9 = vmul.f32 0.6931472, %v1611_v26  ;;  %v1170_v59 = vsub.f32 %v975_v0, %v1138_v30  ;;  %v1613_v28 = vpop.eup %1612 }
 0x312   : > { %1622 = vlog2.f32 %v932_v51  ;;  %v957_v61 = vmul.f32 0.6931472, %v1613_v28 }
 0x313   : > { %v1615_v31 = vpop.eup %1614  ;;  %1187 = vst.msk [vmem:[%s1946_s25 + $0x38] sm:$0xff] %vm1179_vm0, %v1170_v59  ;;  %v977_v39 = vadd.f32 %v955_v9, %v2218_v12  ;;  %v976_v12 = vadd.f32 %v953_v47, %v2220_v15 }
 0x314   : > { %v1617_v8 = vpop.eup %1616  ;;  %v1144_v42 = vpop.xlane.xlu1 %1143  ;;  %v963_v57 = vmul.f32 0.6931472, %v1615_v31 }
 0x315   : > { %v1135_v44 = vpop.xlane.xlu0 %1134  ;;  %v959_v46 = vmul.f32 0.6931472, %v1617_v8  ;;  %v1172_v21 = vsub.f32 %v977_v39, %v1144_v42 }
 0x316   : > { %v1169_v23 = vsub.f32 %v974_v13, %v1135_v44  ;;  %v981_v41 = vadd.f32 %v963_v57, %v2230_v24 }
 0x317   : > { %v1619_v40 = vpop.eup %1618  ;;  %1189 = vst.msk [vmem:[%s1946_s25 + $0x48] sm:$0xff] %vm1179_vm0, %v1172_v21  ;;  %v979_v29 = vadd.f32 %v959_v46, %v2222_v16  ;;  %v978_v16 = vadd.f32 %v957_v61, %v2224_v19 }
 0x318   : > { %1186 = vst.msk [vmem:[%s1946_s25 + $0x30] sm:$0xff] %vm1179_vm0, %v1169_v23  ;;  %v1621_v11 = vpop.eup %1620  ;;  %v1150_v36 = vpop.xlane.xlu1 %1149  ;;  %v967_v56 = vmul.f32 0.6931472, %v1619_v40 }
 0x319   : > { %v1141_v5 = vpop.xlane.xlu0 %1140  ;;  %v1174_v25 = vsub.f32 %v979_v29, %v1150_v36  ;;  %v961_v49 = vmul.f32 0.6931472, %v1621_v11 }
 0x31a   : > { %v1171_v50 = vsub.f32 %v976_v12, %v1141_v5  ;;  %v983_v6 = vadd.f32 %v967_v56, %v2245_v43 }
 0x31b   : > { %1191 = vst.msk [vmem:[%s1946_s25 + $0x58] sm:$0xff] %vm1179_vm0, %v1174_v25  ;;  %v980_v60 = vadd.f32 %v961_v49, %v2232_v27 }
 0x31c   : > { %1188 = vst.msk [vmem:[%s1946_s25 + $0x40] sm:$0xff] %vm1179_vm0, %v1171_v50  ;;  %v1623_v15 = vpop.eup %1622  ;;  %v1156_v17 = vpop.xlane.xlu1 %1155 }
 0x31d   : > { %v1147_v63 = vpop.xlane.xlu0 %1146  ;;  %v1176_v45 = vsub.f32 %v981_v41, %v1156_v17  ;;  %v965_v2 = vmul.f32 0.6931472, %v1623_v15 }
 0x31e   : > { %v1173_v20 = vsub.f32 %v978_v16, %v1147_v63 }
 0x31f   : > { %1193 = vst.msk [vmem:[%s1946_s25 + $0x68] sm:$0xff] %vm1179_vm0, %v1176_v45  ;;  %v982_v4 = vadd.f32 %v965_v2, %v2252_v52 }
 0x320   : > { %1190 = vst.msk [vmem:[%s1946_s25 + $0x50] sm:$0xff] %vm1179_vm0, %v1173_v20  ;;  %v1162_v24 = vpop.xlane.xlu1 %1161 }
 0x321   : > { %v1153_v35 = vpop.xlane.xlu0 %1152  ;;  %v1178_v37 = vsub.f32 %v983_v6, %v1162_v24 }
 0x322   : > { %v1175_v19 = vsub.f32 %v980_v60, %v1153_v35 }
 0x323   : > { %1195 = vst.msk [vmem:[%s1946_s25 + $0x78] sm:$0xff] %vm1179_vm0, %v1178_v37 }
 0x324   : > { %1192 = vst.msk [vmem:[%s1946_s25 + $0x60] sm:$0xff] %vm1179_vm0, %v1175_v19 }
 0x325   : > { %v1159_v3 = vpop.xlane.xlu0 %1158 }
 0x326   : > { %v1177_v54 = vsub.f32 %v982_v4, %v1159_v3 }
 0x328   : > { %1194 = vst.msk [vmem:[%s1946_s25 + $0x70] sm:$0xff] %vm1179_vm0, %v1177_v54 }
 0x329 PF: > { %s18_s22 = sadd.s32 1, %s1752_s22   ;;  %s2482_s15 = smov %s1728_s16 }
 0x32a   : > { %p15_p8 = scmp.ge.s32.totalorder %s18_s22, 6   ;;  %s2483_s16 = smov %s1732_s17 }
 0x32b   : > { %s2484_s17 = smov %s1892_s13  ;;  %s2485_s18 = smov %s1744_s20 }
 0x32c   : > { %s2486_s19 = smov %s1748_s21  ;;  %s2487_s20 = smov %s2490_s23 }
 0x32d   : > { %s2488_s21 = smov %s2494_s27  ;;  %17 = sbr.rel (!%p15_p8) target bundleno = 6 (0x6), region = 93 }
 0x334   :  { %1218 = vsyncpa [#allocation4], 1 }
 0x335   :  { %1220 = vsyncpa [#allocation4 + $0x1], 1 }
 0x336   :  { %1221 = vsyncpa [#allocation6], 1 }

</bundles_post_ra>
